<compile_context>
chip_gen: v6e
topology: v6e:2x2x1
jax: 0.10.0
libtpu: 0.0.40
codegen_flags: <defaults>
</compile_context>

<pallas_src>
import functools
import math

import jax
import jax.numpy as jnp
from jax.experimental import pallas as pl
from jax.experimental.pallas import tpu as pltpu


def _discriminator_kernel(x3_ref,
                          w1_ref, b1_ref, w2_ref, b2_ref,
                          w3_ref, b3_ref, w4_ref, b4_ref,
                          out_ref, *, T, act_dtype):
    rows = x3_ref.shape[0]                          # bb * T, multiple of 128

    # Per-trajectory boundary masks (realize Conv1d padding=1), built once per
    # grid step and shared by layers 2-4 (layer 1 is pre-tapped in the wrapper).
    t_idx = jax.lax.broadcasted_iota(jnp.int32, (rows, 1), 0) % T
    not_first = t_idx != 0                          # h[t-1] exists in-trajectory
    not_last = t_idx != (T - 1)                     # h[t+1] exists in-trajectory

    def taps(h):
        """(rows, C) -> (rows, 3*C) = [h[t-1] | h[t] | h[t+1]], zero padded at
        every trajectory boundary.  Shifts are XLU sublane rotations
        (pltpu.roll) rather than slice+concat copies; the rows that wrap
        around are exactly the rows the boundary masks zero out."""
        h_m1 = jnp.where(not_first, pltpu.roll(h, shift=1, axis=0), 0.0)
        h_p1 = jnp.where(not_last, pltpu.roll(h, shift=rows - 1, axis=0), 0.0)
        return jnp.concatenate([h_m1, h, h_p1], axis=-1)

    def conv(h, w_ref, b_ref):
        x3 = taps(h).astype(w_ref.dtype)            # bf16 into the MXU
        return jnp.dot(x3, w_ref[...],
                       preferred_element_type=jnp.float32) + b_ref[...]

    # Layer 1: the 3-tap input slab is pre-built in the wrapper -> one matmul.
    h = jnp.dot(x3_ref[...], w1_ref[...],
                preferred_element_type=jnp.float32) + b1_ref[...]
    h = jnp.maximum(h, 0.0).astype(act_dtype)                          # (rows, 32)
    h = jnp.maximum(conv(h, w2_ref, b2_ref), 0.0).astype(act_dtype)    # (rows, 64)
    h = jnp.maximum(conv(h, w3_ref, b3_ref), 0.0).astype(act_dtype)    # (rows, 32)

    # Last layer (Cout = 1): VPU multiply + lane reduction; keeps the MXU free
    # and avoids a 1-wide systolic result column.
    x3 = taps(h).astype(jnp.float32)                                   # (rows, 96)
    y = jnp.sum(x3 * w4_ref[...], axis=-1, keepdims=True) + b4_ref[...]

    # Lane-dense store: reshape the (rows, 1) column into a (rows//128, 128)
    # slab so every store is a full-width unmasked vst and the output buffer
    # is not 128x lane-padded.
    out_ref[...] = y.reshape(rows // 128, 128).astype(out_ref.dtype)


def _cdiv(a, b):
    return -(-a // b)


def _round_up(x, m):
    return _cdiv(x, m) * m


def _pick_batch_block(B, T, target_rows):
    """Pick the per-step trajectory count bb such that
       * bb * T is a multiple of 128 (lane-dense output slab),
       * bb * T is close to target_rows (amortize per-step overhead),
       * bb never exceeds the (rounded-up) batch (no pointless padding),
       * the grid has >= 2 steps when the batch allows it (v7x dual-TC)."""
    m = 128 // math.gcd(T, 128)                 # smallest bb with bb*T % 128 == 0
    bb = max(m, (max(target_rows, m * T) // T) // m * m)
    bb = min(bb, _round_up(B, m))
    if _cdiv(B, bb) < 2:                        # keep both v7x TensorCores busy
        bb_half = _round_up(_cdiv(B, 2), m)
        if m <= bb_half < bb:
            bb = bb_half
    return bb


def discriminator_forward(traj, traj_rel, params, *,
                          target_rows=8192, act_dtype=jnp.float32):
    """traj is unused by the reference forward (kept for signature parity).

    act_dtype: dtype of the intermediate activations on the elementwise
    (ReLU / roll / mask) path.  f32 is required on v5e (no bf16 VALU) and is
    the portable default; jnp.bfloat16 halves the plumbing bytes on v6e/v7x
    but should be gated by tolerance tests before enabling.
    """
    del traj
    B, T, _ = traj_rel.shape
    (w1, b1), (w2, b2), (w3, b3), (w4, b4) = params

    # bf16 matmul inputs (f32 accumulation happens inside the kernel); the
    # last layer's weight and all biases stay f32 (VPU path).
    w1, w2, w3 = (w.astype(jnp.bfloat16) for w in (w1, w2, w3))
    b1, b2, b3 = (b.astype(jnp.float32) for b in (b1, b2, b3))
    w4 = w4.astype(jnp.float32)
    b4 = b4.astype(jnp.float32)

    bb = _pick_batch_block(B, T, target_rows)
    n_blocks = _cdiv(B, bb)
    B_pad = n_blocks * bb                        # pad awkward batches (review)
    rows = bb * T                                # multiple of 128 by construction

    # Pre-tap the layer-1 input in XLA (layout plumbing, not compute hoisting):
    # a (B_pad*T, 6) bf16 slab replaces the 2->128 lane-padded (bb, T, 2) input
    # block and removes the first in-kernel shift/mask pass.
    x = traj_rel.astype(jnp.float32)
    if B_pad != B:
        x = jnp.pad(x, ((0, B_pad - B), (0, 0), (0, 0)))
    xp = jnp.pad(x, ((0, 0), (1, 1), (0, 0)))                   # conv padding=1
    x3 = jnp.concatenate([xp[:, :-2], xp[:, 1:-1], xp[:, 2:]], axis=-1)
    x3 = x3.reshape(B_pad * T, 6).astype(jnp.bfloat16)          # [t-1 | t | t+1]

    resident = lambda a: pl.BlockSpec(a.shape, lambda i, _a=a: (0,) * _a.ndim)

    kernel = functools.partial(_discriminator_kernel, T=T, act_dtype=act_dtype)

    out = pl.pallas_call(
        kernel,
        out_shape=jax.ShapeDtypeStruct((B_pad * T // 128, 128), jnp.float32),
        grid=(n_blocks,),
        in_specs=[
            pl.BlockSpec((rows, 6), lambda i: (i, 0)),           # pre-tapped input
            resident(w1), resident(b1),
            resident(w2), resident(b2),
            resident(w3), resident(b3),
            resident(w4), resident(b4),
        ],
        out_specs=pl.BlockSpec((rows // 128, 128), lambda i: (i, 0)),
        compiler_params=pltpu.CompilerParams(
            dimension_semantics=("parallel",),
            # 48 MiB: covers rows~8K blocks in f32 plumbing, and stays under
            # v7x's 64 MiB physical VMEM (v5e/v6e have 128 MiB physical).
            vmem_limit_bytes=48 * 1024 * 1024),
    )(x3, w1, b1, w2, b2, w3, b3, w4, b4)

    # torch: output.squeeze() -> (B, T) for B > 1 (torch would give (T,) for B == 1).
    return out.reshape(-1)[: B * T].reshape(B, T)


def make_params(key, d_conv_dim=64, k=3):
    """Deterministic synthetic weights in the fused kernel layout.

    A torch Conv1d weight (Cout, Cin, K) maps to the fused layout via
        w_fused = w_torch.transpose(2, 1, 0).reshape(K * Cin, Cout)
    (tap-concat columns are [k=0 | k=1 | k=2], each Cin wide, i.e. matching
    the [h[t-1] | h[t] | h[t+1]] tap order).  The last layer (Cout = 1) is
    stored transposed as (1, K*Cin) for the VPU-reduction path; biases are
    kept 2D (1, Cout).
    """
    dims = [(2, d_conv_dim // 2), (d_conv_dim // 2, d_conv_dim),
            (d_conv_dim, d_conv_dim // 2), (d_conv_dim // 2, 1)]
    params = []
    for li, (cin, cout) in enumerate(dims):
        key, kw, kb = jax.random.split(key, 3)
        scale = 1.0 / jnp.sqrt(cin * k)
        w = jax.random.uniform(kw, (k * cin, cout), jnp.float32, -scale, scale)
        b = jax.random.uniform(kb, (1, cout), jnp.float32, -scale, scale)
        if li == 3:                       # last layer: (1, 3*Cin) for VPU path
            w = w.T
        params.append((w, b))
    return params


def _reference_forward(traj_rel, params):
    """Pure-JAX f32 reference of the torch Discriminator forward (same fused
    weight layout), used to tolerance-gate the bf16 matmul inputs."""
    (w1, b1), (w2, b2), (w3, b3), (w4, b4) = params

    def conv1d(h, w_fused, b):
        hp = jnp.pad(h, ((0, 0), (1, 1), (0, 0)))
        h3 = jnp.concatenate([hp[:, :-2], hp[:, 1:-1], hp[:, 2:]], axis=-1)
        return h3 @ w_fused + b

    h = jax.nn.relu(conv1d(traj_rel, w1, b1))
    h = jax.nn.relu(conv1d(h, w2, b2))
    h = jax.nn.relu(conv1d(h, w3, b3))
    y = conv1d(h, w4.T, b4)              # w4 stored (1, 3*Cin) -> (3*Cin, 1)
    return y[..., 0]


if __name__ == "__main__":
    key = jax.random.PRNGKey(0)
    k_traj, k_rel, k_par = jax.random.split(key, 3)

    B, T = 2, 16
    traj = jax.random.normal(k_traj, (B, T, 2), jnp.float32)
    traj_rel = jax.random.normal(k_rel, (B, T, 2), jnp.float32)
    params = make_params(k_par)

    out = discriminator_forward(traj, traj_rel, params)
    jax.block_until_ready(out)
    assert out.shape == (B, T), out.shape

    ref = _reference_forward(traj_rel, params)
    max_err = float(jnp.max(jnp.abs(out - ref)))
    assert max_err < 1e-1, f"max abs err vs f32 reference: {max_err}"

    print("KERNEL_OK")
</pallas_src>

<mosaic_0001>
module attributes {stable_mosaic.version = 11 : i64} {
  func.func @_discriminator_kernel(%arg0: i32, %arg1: memref<128x6xbf16, #tpu.memory_space<vmem>>, %arg2: memref<6x32xbf16, #tpu.memory_space<vmem>>, %arg3: memref<1x32xf32, #tpu.memory_space<vmem>>, %arg4: memref<96x64xbf16, #tpu.memory_space<vmem>>, %arg5: memref<1x64xf32, #tpu.memory_space<vmem>>, %arg6: memref<192x32xbf16, #tpu.memory_space<vmem>>, %arg7: memref<1x32xf32, #tpu.memory_space<vmem>>, %arg8: memref<1x96xf32, #tpu.memory_space<vmem>>, %arg9: memref<1x1xf32, #tpu.memory_space<vmem>>, %arg10: memref<1x128xf32, #tpu.memory_space<vmem>>) attributes {dimension_semantics = [#tpu.dimension_semantics<parallel>], iteration_bounds = array<i64: 1>, scalar_prefetch = 0 : i64, scratch_operands = 0 : i64, tpu.core_type = #tpu.core_type<tc>, window_params = [{transform_indices = @transform_0, window_bounds = array<i64: 128, 6>}, {pipeline_mode = #tpu.pipeline_mode<synchronous>, transform_indices = @transform_1, window_bounds = array<i64: 6, 32>}, {pipeline_mode = #tpu.pipeline_mode<synchronous>, transform_indices = @transform_2, window_bounds = array<i64: 1, 32>}, {pipeline_mode = #tpu.pipeline_mode<synchronous>, transform_indices = @transform_3, window_bounds = array<i64: 96, 64>}, {pipeline_mode = #tpu.pipeline_mode<synchronous>, transform_indices = @transform_4, window_bounds = array<i64: 1, 64>}, {pipeline_mode = #tpu.pipeline_mode<synchronous>, transform_indices = @transform_5, window_bounds = array<i64: 192, 32>}, {pipeline_mode = #tpu.pipeline_mode<synchronous>, transform_indices = @transform_6, window_bounds = array<i64: 1, 32>}, {pipeline_mode = #tpu.pipeline_mode<synchronous>, transform_indices = @transform_7, window_bounds = array<i64: 1, 96>}, {pipeline_mode = #tpu.pipeline_mode<synchronous>, transform_indices = @transform_8, window_bounds = array<i64: 1, 1>}, {transform_indices = @transform_9, window_bounds = array<i64: 1, 128>}]} {
    %0 = tpu.iota {dimensions = array<i32: 0>} : vector<128x1xi32>
    %c16_i32 = arith.constant 16 : i32
    %c0_i32 = arith.constant 0 : i32
    %1 = arith.cmpi eq, %c16_i32, %c0_i32 : i32
    %c1_i32 = arith.constant 1 : i32
    %2 = arith.select %1, %c1_i32, %c16_i32 : i32
    %3 = vector.broadcast %2 : i32 to vector<128x1xi32>
    %4 = arith.remsi %0, %3 : vector<128x1xi32>
    %c0_i32_0 = arith.constant 0 : i32
    %5 = vector.broadcast %c0_i32_0 : i32 to vector<128x1xi32>
    %6 = arith.cmpi ne, %4, %5 : vector<128x1xi32>
    %c0_i32_1 = arith.constant 0 : i32
    %7 = vector.broadcast %c0_i32_1 : i32 to vector<128x1xi32>
    %8 = arith.cmpi slt, %4, %7 : vector<128x1xi32>
    %c0_i32_2 = arith.constant 0 : i32
    %9 = arith.cmpi slt, %2, %c0_i32_2 : i32
    %10 = vector.broadcast %9 : i1 to vector<128x1xi1>
    %11 = vector.broadcast %10 : vector<128x1xi1> to vector<128x1xi1>
    %12 = arith.xori %8, %11 : vector<128x1xi1>
    %13 = arith.andi %12, %6 : vector<128x1xi1>
    %14 = vector.broadcast %2 : i32 to vector<128x1xi32>
    %15 = arith.addi %4, %14 : vector<128x1xi32>
    %16 = arith.select %13, %15, %4 : vector<128x1xi1>, vector<128x1xi32>
    %c0_i32_3 = arith.constant 0 : i32
    %17 = vector.broadcast %c0_i32_3 : i32 to vector<128x1xi32>
    %18 = arith.cmpi ne, %16, %17 : vector<128x1xi32>
    %c15_i32 = arith.constant 15 : i32
    %19 = vector.broadcast %c15_i32 : i32 to vector<128x1xi32>
    %20 = arith.cmpi ne, %16, %19 : vector<128x1xi32>
    %c0 = arith.constant 0 : index
    %c0_4 = arith.constant 0 : index
    %21 = vector.load %arg1[%c0, %c0_4] : memref<128x6xbf16, #tpu.memory_space<vmem>>, vector<128x6xbf16>
    %c0_5 = arith.constant 0 : index
    %c0_6 = arith.constant 0 : index
    %22 = vector.load %arg2[%c0_5, %c0_6] : memref<6x32xbf16, #tpu.memory_space<vmem>>, vector<6x32xbf16>
    %cst = arith.constant dense<0.000000e+00> : vector<128x32xf32>
    %23 = tpu.matmul %21, %22, %cst {dimension_numbers = #tpu.dot_dimension_numbers<[1], [0], [0], [1], [0, 0, 1, 1], [], []>} : vector<128x6xbf16>, vector<6x32xbf16>, vector<128x32xf32> -> vector<128x32xf32>
    %c0_7 = arith.constant 0 : index
    %c0_8 = arith.constant 0 : index
    %24 = vector.load %arg3[%c0_7, %c0_8] : memref<1x32xf32, #tpu.memory_space<vmem>>, vector<1x32xf32>
    %25 = vector.broadcast %24 : vector<1x32xf32> to vector<128x32xf32>
    %26 = arith.addf %23, %25 : vector<128x32xf32>
    %cst_9 = arith.constant 0.000000e+00 : f32
    %27 = vector.broadcast %cst_9 : f32 to vector<128x32xf32>
    %28 = arith.maximumf %26, %27 : vector<128x32xf32>
    %c1_i32_10 = arith.constant 1 : i32
    %29 = tpu.dynamic_rotate %28 by %c1_i32_10 dim 0 : vector<128x32xf32>, i32 -> vector<128x32xf32>
    %cst_11 = arith.constant 0.000000e+00 : f32
    %30 = vector.shape_cast %18 : vector<128x1xi1> to vector<128x1xi1>
    %31 = vector.broadcast %30 : vector<128x1xi1> to vector<128x32xi1>
    %32 = vector.broadcast %cst_11 : f32 to vector<128x32xf32>
    %33 = arith.select %31, %29, %32 : vector<128x32xi1>, vector<128x32xf32>
    %c127_i32 = arith.constant 127 : i32
    %34 = tpu.dynamic_rotate %28 by %c127_i32 dim 0 : vector<128x32xf32>, i32 -> vector<128x32xf32>
    %cst_12 = arith.constant 0.000000e+00 : f32
    %35 = vector.shape_cast %20 : vector<128x1xi1> to vector<128x1xi1>
    %36 = vector.broadcast %35 : vector<128x1xi1> to vector<128x32xi1>
    %37 = vector.broadcast %cst_12 : f32 to vector<128x32xf32>
    %38 = arith.select %36, %34, %37 : vector<128x32xi1>, vector<128x32xf32>
    %39 = tpu.concatenate %33, %28, %38 in 1 : vector<128x32xf32>, vector<128x32xf32>, vector<128x32xf32> -> vector<128x96xf32>
    %40 = arith.truncf %39 : vector<128x96xf32> to vector<128x96xbf16>
    %c0_13 = arith.constant 0 : index
    %c0_14 = arith.constant 0 : index
    %41 = vector.load %arg4[%c0_13, %c0_14] : memref<96x64xbf16, #tpu.memory_space<vmem>>, vector<96x64xbf16>
    %cst_15 = arith.constant dense<0.000000e+00> : vector<128x64xf32>
    %42 = tpu.matmul %40, %41, %cst_15 {dimension_numbers = #tpu.dot_dimension_numbers<[1], [0], [0], [1], [0, 0, 1, 1], [], []>} : vector<128x96xbf16>, vector<96x64xbf16>, vector<128x64xf32> -> vector<128x64xf32>
    %c0_16 = arith.constant 0 : index
    %c0_17 = arith.constant 0 : index
    %43 = vector.load %arg5[%c0_16, %c0_17] : memref<1x64xf32, #tpu.memory_space<vmem>>, vector<1x64xf32>
    %44 = vector.broadcast %43 : vector<1x64xf32> to vector<128x64xf32>
    %45 = arith.addf %42, %44 : vector<128x64xf32>
    %cst_18 = arith.constant 0.000000e+00 : f32
    %46 = vector.broadcast %cst_18 : f32 to vector<128x64xf32>
    %47 = arith.maximumf %45, %46 : vector<128x64xf32>
    %c1_i32_19 = arith.constant 1 : i32
    %48 = tpu.dynamic_rotate %47 by %c1_i32_19 dim 0 : vector<128x64xf32>, i32 -> vector<128x64xf32>
    %cst_20 = arith.constant 0.000000e+00 : f32
    %49 = vector.shape_cast %18 : vector<128x1xi1> to vector<128x1xi1>
    %50 = vector.broadcast %49 : vector<128x1xi1> to vector<128x64xi1>
    %51 = vector.broadcast %cst_20 : f32 to vector<128x64xf32>
    %52 = arith.select %50, %48, %51 : vector<128x64xi1>, vector<128x64xf32>
    %c127_i32_21 = arith.constant 127 : i32
    %53 = tpu.dynamic_rotate %47 by %c127_i32_21 dim 0 : vector<128x64xf32>, i32 -> vector<128x64xf32>
    %cst_22 = arith.constant 0.000000e+00 : f32
    %54 = vector.shape_cast %20 : vector<128x1xi1> to vector<128x1xi1>
    %55 = vector.broadcast %54 : vector<128x1xi1> to vector<128x64xi1>
    %56 = vector.broadcast %cst_22 : f32 to vector<128x64xf32>
    %57 = arith.select %55, %53, %56 : vector<128x64xi1>, vector<128x64xf32>
    %58 = tpu.concatenate %52, %47, %57 in 1 : vector<128x64xf32>, vector<128x64xf32>, vector<128x64xf32> -> vector<128x192xf32>
    %59 = arith.truncf %58 : vector<128x192xf32> to vector<128x192xbf16>
    %c0_23 = arith.constant 0 : index
    %c0_24 = arith.constant 0 : index
    %60 = vector.load %arg6[%c0_23, %c0_24] : memref<192x32xbf16, #tpu.memory_space<vmem>>, vector<192x32xbf16>
    %cst_25 = arith.constant dense<0.000000e+00> : vector<128x32xf32>
    %61 = tpu.matmul %59, %60, %cst_25 {dimension_numbers = #tpu.dot_dimension_numbers<[1], [0], [0], [1], [0, 0, 1, 1], [], []>} : vector<128x192xbf16>, vector<192x32xbf16>, vector<128x32xf32> -> vector<128x32xf32>
    %c0_26 = arith.constant 0 : index
    %c0_27 = arith.constant 0 : index
    %62 = vector.load %arg7[%c0_26, %c0_27] : memref<1x32xf32, #tpu.memory_space<vmem>>, vector<1x32xf32>
    %63 = vector.broadcast %62 : vector<1x32xf32> to vector<128x32xf32>
    %64 = arith.addf %61, %63 : vector<128x32xf32>
    %cst_28 = arith.constant 0.000000e+00 : f32
    %65 = vector.broadcast %cst_28 : f32 to vector<128x32xf32>
    %66 = arith.maximumf %64, %65 : vector<128x32xf32>
    %c1_i32_29 = arith.constant 1 : i32
    %67 = tpu.dynamic_rotate %66 by %c1_i32_29 dim 0 : vector<128x32xf32>, i32 -> vector<128x32xf32>
    %cst_30 = arith.constant 0.000000e+00 : f32
    %68 = vector.shape_cast %18 : vector<128x1xi1> to vector<128x1xi1>
    %69 = vector.broadcast %68 : vector<128x1xi1> to vector<128x32xi1>
    %70 = vector.broadcast %cst_30 : f32 to vector<128x32xf32>
    %71 = arith.select %69, %67, %70 : vector<128x32xi1>, vector<128x32xf32>
    %c127_i32_31 = arith.constant 127 : i32
    %72 = tpu.dynamic_rotate %66 by %c127_i32_31 dim 0 : vector<128x32xf32>, i32 -> vector<128x32xf32>
    %cst_32 = arith.constant 0.000000e+00 : f32
    %73 = vector.shape_cast %20 : vector<128x1xi1> to vector<128x1xi1>
    %74 = vector.broadcast %73 : vector<128x1xi1> to vector<128x32xi1>
    %75 = vector.broadcast %cst_32 : f32 to vector<128x32xf32>
    %76 = arith.select %74, %72, %75 : vector<128x32xi1>, vector<128x32xf32>
    %77 = tpu.concatenate %71, %66, %76 in 1 : vector<128x32xf32>, vector<128x32xf32>, vector<128x32xf32> -> vector<128x96xf32>
    %c0_33 = arith.constant 0 : index
    %c0_34 = arith.constant 0 : index
    %78 = vector.load %arg8[%c0_33, %c0_34] : memref<1x96xf32, #tpu.memory_space<vmem>>, vector<1x96xf32>
    %79 = vector.broadcast %78 : vector<1x96xf32> to vector<128x96xf32>
    %80 = arith.mulf %77, %79 : vector<128x96xf32>
    %cst_35 = arith.constant dense<0.000000e+00> : vector<128xf32>
    %81 = vector.multi_reduction <add>, %80, %cst_35 [1] : vector<128x96xf32> to vector<128xf32>
    %82 = vector.shape_cast %81 : vector<128xf32> to vector<128x1xf32>
    %c0_36 = arith.constant 0 : index
    %c0_37 = arith.constant 0 : index
    %83 = vector.load %arg9[%c0_36, %c0_37] : memref<1x1xf32, #tpu.memory_space<vmem>>, vector<1x1xf32>
    %84 = vector.broadcast %83 : vector<1x1xf32> to vector<128x1xf32>
    %85 = arith.addf %82, %84 : vector<128x1xf32>
    %86 = vector.shape_cast %85 : vector<128x1xf32> to vector<1x128xf32>
    %c0_38 = arith.constant 0 : index
    %c0_39 = arith.constant 0 : index
    %87 = vector.load %arg10[%c0_38, %c0_39] : memref<1x128xf32, #tpu.memory_space<vmem>>, vector<1x128xf32>
    tpu.vector_store %arg10[%c0_38, %c0_39], %86 {strides = array<i32>} : memref<1x128xf32, #tpu.memory_space<vmem>>, vector<1x128xf32>,
    return
  }
  func.func @transform_0(%arg0: i32) -> (i32, i32) {
    %c0_i32 = arith.constant 0 : i32
    %c0_i32_0 = arith.constant 0 : i32
    return %arg0, %c0_i32 : i32, i32
  }
  func.func @transform_1(%arg0: i32) -> (i32, i32) {
    %c0_i32 = arith.constant 0 : i32
    %c0_i32_0 = arith.constant 0 : i32
    %c0_i32_1 = arith.constant 0 : i32
    return %c0_i32, %c0_i32_0 : i32, i32
  }
  func.func @transform_2(%arg0: i32) -> (i32, i32) {
    %c0_i32 = arith.constant 0 : i32
    %c0_i32_0 = arith.constant 0 : i32
    %c0_i32_1 = arith.constant 0 : i32
    return %c0_i32, %c0_i32_0 : i32, i32
  }
  func.func @transform_3(%arg0: i32) -> (i32, i32) {
    %c0_i32 = arith.constant 0 : i32
    %c0_i32_0 = arith.constant 0 : i32
    %c0_i32_1 = arith.constant 0 : i32
    return %c0_i32, %c0_i32_0 : i32, i32
  }
  func.func @transform_4(%arg0: i32) -> (i32, i32) {
    %c0_i32 = arith.constant 0 : i32
    %c0_i32_0 = arith.constant 0 : i32
    %c0_i32_1 = arith.constant 0 : i32
    return %c0_i32, %c0_i32_0 : i32, i32
  }
  func.func @transform_5(%arg0: i32) -> (i32, i32) {
    %c0_i32 = arith.constant 0 : i32
    %c0_i32_0 = arith.constant 0 : i32
    %c0_i32_1 = arith.constant 0 : i32
    return %c0_i32, %c0_i32_0 : i32, i32
  }
  func.func @transform_6(%arg0: i32) -> (i32, i32) {
    %c0_i32 = arith.constant 0 : i32
    %c0_i32_0 = arith.constant 0 : i32
    %c0_i32_1 = arith.constant 0 : i32
    return %c0_i32, %c0_i32_0 : i32, i32
  }
  func.func @transform_7(%arg0: i32) -> (i32, i32) {
    %c0_i32 = arith.constant 0 : i32
    %c0_i32_0 = arith.constant 0 : i32
    %c0_i32_1 = arith.constant 0 : i32
    return %c0_i32, %c0_i32_0 : i32, i32
  }
  func.func @transform_8(%arg0: i32) -> (i32, i32) {
    %c0_i32 = arith.constant 0 : i32
    %c0_i32_0 = arith.constant 0 : i32
    %c0_i32_1 = arith.constant 0 : i32
    return %c0_i32, %c0_i32_0 : i32, i32
  }
  func.func @transform_9(%arg0: i32) -> (i32, i32) {
    %c0_i32 = arith.constant 0 : i32
    %c0_i32_0 = arith.constant 0 : i32
    return %arg0, %c0_i32 : i32, i32
  }
}

</mosaic_0001>

<bundles_post_ra>
// kernel: tpu_custom_call.1
= control target key start
LH: loop header
LB: loop body
LE: loop exit
PB: predicated region body
PF: predicated region fallthrough
CT: control target
= control target key end

     0   :  { %s3352_s0 = inlined_call_operand.vmem [shape: bf16[128,6], index: 0, kind: input, shape index: {}]   ;;  %s3353_s1 = inlined_call_operand.vmem [shape: bf16[6,32], index: 1, kind: input, shape index: {}]   ;;  %s3354_s2 = inlined_call_operand.vmem [shape: f32[1,32], index: 2, kind: input, shape index: {}]   ;;  %s3355_s3 = inlined_call_operand.vmem [shape: bf16[96,64], index: 3, kind: input, shape index: {}]   ;;  %s3356_s4 = inlined_call_operand.vmem [shape: f32[1,64], index: 4, kind: input, shape index: {}]   ;;  %s3357_s5 = inlined_call_operand.vmem [shape: bf16[192,32], index: 5, kind: input, shape index: {}]   ;;  %s3358_s6 = inlined_call_operand.vmem [shape: f32[1,32], index: 6, kind: input, shape index: {}]   ;;  %s3359_s7 = inlined_call_operand.vmem [shape: f32[1,96], index: 7, kind: input, shape index: {}]   ;;  %s3360_s8 = inlined_call_operand.<no memory space> [shape: f32[1,1], index: 8, kind: input, shape index: {}]   ;;  %s3361_s9 = inlined_call_operand.hbm [shape: f32[1,128], index: 9, kind: output, shape index: {}]  }
   0x1   :  { %v14_v0 = vstv %s3360_s8 }
   0x2   :  { %15 = vst [vmem:[#allocation2] sm:$0x1] %v14_v0 }
   0x3   :  { %v293_v1 = vld [vmem:[%s3353_s1] sm:$0x7]  ;;  %vm366_vm0 = vcmask 1042432   ;;  %vm341_vm1 = vcmask 48128   ;;  %v2257_v4 = vld [vmem:[%s3352_s0 + $0x8] sm:$0xff]   ;;  %v2258_v5 = vld [vmem:[%s3352_s0 + $0x10] sm:$0xff]  }
   0x4   :  { %v2256_v2 = vld [vmem:[%s3352_s0] sm:$0xff]   ;;  %2129 = vmatprep.subr.msk.bf16.mxu0 %vm366_vm0, %v293_v1  ;;  %v368_v3 = vsel %vm366_vm0, %v293_v1, 0  ;;  %v2259_v6 = vld [vmem:[%s3352_s0 + $0x18] sm:$0xff]   ;;  %v2261_v8 = vld [vmem:[%s3352_s0 + $0x28] sm:$0xff]  }
   0x5   :  { %2060 = vmatpush3.bf16.msra.mxu0 %v368_v3  ;;  %2061 = vmatprep.mubr.msk.bf16.mxu0 %vm341_vm1, %v2256_v2  ;;  %v2260_v7 = vld [vmem:[%s3352_s0 + $0x20] sm:$0xff]   ;;  %v2262_v9 = vld [vmem:[%s3352_s0 + $0x30] sm:$0xff]  }
   0x8   :  { %2062 = vmatmul.mubr.msk.bf16.vlgmr.msra.gmra.mxu0 %vm341_vm1, %v2257_v4 }
   0x9   :  { %2065 = vmatprep.mubr.msk.bf16.mxu0 %vm341_vm1, %v2258_v5 }
  0x10   :  { %2066 = vmatmul.mubr.msk.bf16.gmra.mxu0 %vm341_vm1, %v2259_v6 }
  0x11   :  { %2069 = vmatprep.mubr.msk.bf16.mxu0 %vm341_vm1, %v2260_v7 }
  0x12   :  { %16 = vsyncpa [#allocation4], 0  ;;  %v2263_v10 = vld [vmem:[%s3352_s0 + $0x38] sm:$0xff]   ;;  %v2264_v11 = vld [vmem:[%s3355_s3 + $0x28] sm:$0xff]   ;;  %v36_v14 = vlaneseq  ;;  %s2305_s17 = smov 64   ;;  %vm3371_vm13 = vcmask 261120  }
  0x13   :  { %v2265_v12 = vld [vmem:[%s3355_s3 + $0x20] sm:$0xff]   ;;  %2077 = vmatprep.subr.bf16.mxu1 %v2264_v11  ;;  %v2266_v13 = vld [vmem:[%s3355_s3 + $0x18] sm:$0xff]   ;;  %v2267_v19 = vld [vmem:[%s3355_s3 + $0x10] sm:$0xff]   ;;  %vm3372_vm14 = vcmask 523264   ;;  %vm3370_vm0 = vcmask 785408  }
  0x14   :  { %2078 = vmatpush3.bf16.msra.mxu1 %v2264_v11  ;;  %v2406_v15 = vshrl.u32 %v36_v14, 7  ;;  %v2411_v16 = vld [vmem:[%s3354_s2] ss:$0 sm:$0xff]  ;;  %v2268_v33 = vld [vmem:[%s3355_s3 + $0x8] sm:$0xff]  }
  0x15   :  { %2079 = vmatprep.subr.bf16.mxu1 %v2265_v12  ;;  %v2269_v47 = vld [vmem:[%s3355_s3] sm:$0xff]   ;;  %s2304_s3 = smov 32  }
  0x16   :  { %v38_v18 = vadd.s32 8, %v2406_v15  ;;  %v40_v22 = vadd.s32 24, %v2406_v15  ;;  %v42_v27 = vadd.s32 40, %v2406_v15  ;;  %v44_v31 = vadd.s32 56, %v2406_v15 }
  0x17   :  { %v2426_v32 = vadd.s32 72, %v2406_v15  ;;  %vm3363_vm2 = vcmp.lt.s32.totalorder %v2406_v15, 7  ;;  %vm3362_vm3 = vcmp.lt.s32.totalorder %v2406_v15, 1  ;;  %v48_v61 = vadd.s32 88, %v2406_v15 }
  0x18   :  { %2070 = vmatmul.mubr.msk.bf16.gmra.mxu0 %vm341_vm1, %v2261_v8  ;;  %2080 = vmatpush3.bf16.msra.mxu1 %v2265_v12  ;;  %v64_v26 = vand.u32 15, %v38_v18  ;;  %v78_v30 = vand.u32 15, %v40_v22  ;;  %v92_v41 = vand.u32 15, %v42_v27  ;;  %v106_v45 = vand.u32 15, %v44_v31 }
  0x19   :  { %2073 = vmatprep.mubr.msk.bf16.mxu0 %vm341_vm1, %v2262_v9  ;;  %2081 = vmatprep.subr.bf16.mxu1 %v2266_v13  ;;  %v120_v46 = vand.u32 15, %v2426_v32  ;;  %v2500_v18 = vadd.s32 104, %v2406_v15 }
  0x1a   :  { %vm2439_vm4 = vcmp.ne.s32.totalorder %v64_v26, 15  ;;  %vm2444_vm5 = vcmp.ne.s32.totalorder %v78_v30, 15  ;;  %vm2463_vm6 = vcmp.ne.s32.totalorder %v92_v41, 15  ;;  %vm2495_vm7 = vcmp.ne.s32.totalorder %v106_v45, 15 }
  0x1b   :  { %vm2524_vm8 = vcmp.ne.s32.totalorder %v120_v46, 15 }
  0x1c   :  { %2082 = vmatpush3.bf16.msra.mxu1 %v2266_v13  ;;  %v3384_v13 = vmov 0 }
  0x1d   :  { %2083 = vmatprep.subr.bf16.mxu1 %v2267_v19  ;;  %v3385_v13 = vsel %vm2495_vm7, 4294967295, %v3384_v13 }
  0x20   :  { %2074 = vmatmul.mubr.msk.bf16.gmra.mxu0 %vm341_vm1, %v2263_v10  ;;  %2084 = vmatpush3.bf16.msra.mxu1 %v2267_v19  ;;  %v2503_v19 = vadd.s32 120, %v2406_v15 }
  0x21   :  { %2085 = vmatprep.subr.bf16.mxu1 %v2268_v33 }
  0x24   :  { %2086 = vmatpush3.bf16.msra.mxu1 %v2268_v33 }
  0x25   :  { %2087 = vmatprep.subr.bf16.mxu1 %v2269_v47 }
  0x28   :  { %2088 = vmatpush3.bf16.msra.mxu1 %v2269_v47 }
  0xc8   :  { %v2063_v17 = vpop.f32.mrf.mxu0 }
  0xc9   :  { %v413_v20 = vadd.f32 %v2063_v17, %v2411_v16  ;;  %v134_v17 = vand.u32 15, %v48_v61 }
  0xca   :  { %v404_v21 = vpop.f32.mrf.mxu0 }
  0xcb   :  { %v405_v23 = vadd.f32 %v2411_v16, %v404_v21  ;;  %v2422_v28 = vmax.f32 %v413_v20, 0.0  ;;  %vm2543_vm9 = vcmp.ne.s32.totalorder %v134_v17, 15 }
  0xcc   :  { %v2064_v24 = vpop.f32.mrf.mxu0 }
  0xcd   :  { %v416_v25 = vadd.f32 %v2064_v24, %v2411_v16  ;;  %v2434_v36 = vmax.f32 %v405_v23, 0.0  ;;  %v485_v42 = vrot.slane %v2422_v28, 7  ;;  %v566_v48 = vrot.slane %v2422_v28, 1 }
  0xce   :  { %v407_v29 = vpop.f32.mrf.mxu0 }
  0xcf   :  { %v2431_v34 = vmax.f32 %v416_v25, 0.0  ;;  %v408_v35 = vadd.f32 %v2411_v16, %v407_v29  ;;  %v483_v52 = vrot.slane %v2434_v36, 7  ;;  %v564_v57 = vrot.slane %v2434_v36, 1 }
  0xd0   :  { %v2067_v37 = vpop.f32.mrf.mxu0 }
  0xd1   :  { %v486_v38 = vrot.slane %v2431_v34, 7  ;;  %v468_v39 = vmax.f32 %v408_v35, 0.0  ;;  %v429_v53 = vadd.f32 %v2067_v37, %v2411_v16  ;;  %v567_v62 = vrot.slane %v2431_v34, 1 }
  0xd2   :  { %v420_v43 = vpop.f32.mrf.mxu0  ;;  %v2139_v10 = vpack.i.bf16 %v2431_v34, %v2422_v28 }
  0xd3   :  { %v484_v49 = vrot.slane %v468_v39, 7  ;;  %v565_v50 = vrot.slane %v468_v39, 1  ;;  %v421_v51 = vadd.f32 %v2411_v16, %v420_v43  ;;  %v2134_v55 = vpack.i.bf16 %v468_v39, %v2434_v36 }
  0xd4   :  { %v2068_v54 = vpop.f32.mrf.mxu0  ;;  %v2459_v56 = vsel %vm3362_vm3, %v485_v42, %v486_v38  ;;  %v2487_v7 = vmax.f32 %v429_v53, 0.0  ;;  %v593_v28 = vsel %vm3363_vm2, %v566_v48, %v567_v62  ;;  %v3386_v39 = vmov 0 }
  0xd5   :  { %v471_v58 = vmax.f32 %v421_v51, 0.0  ;;  %v432_v59 = vadd.f32 %v2068_v54, %v2411_v16  ;;  %2135 = vrot.lane.b32.xlu0 %v2134_v55, %s2304_s3  ;;  %v594_v0 = vsel %vm3363_vm2, %v565_v50, %v566_v48  ;;  %v2474_v1 = vsel %vm3362_vm3, %v484_v49, %v485_v42 }
  0xd6   :  { %v423_v63 = vpop.f32.mrf.mxu0  ;;  %v2480_v2 = vsel %vm3362_vm3, %v483_v52, %v484_v49  ;;  %v595_v6 = vsel %vm3363_vm2, %v564_v57, %v565_v50  ;;  %v630_v11 = vsel %vm2439_vm4, %v594_v0, 0.0  ;;  %v570_v29 = vrot.slane %v2487_v7, 1 }
  0xd7   :  { %v487_v3 = vrot.slane %v471_v58, 7  ;;  %v568_v4 = vrot.slane %v471_v58, 1  ;;  %v424_v5 = vadd.f32 %v2411_v16, %v423_v63  ;;  %v2489_v8 = vmax.f32 %v432_v59, 0.0 }
  0xd8   :  { %v2071_v9 = vpop.f32.mrf.mxu0  ;;  %v2144_v21 = vpack.i.bf16 %v630_v11, %v595_v6  ;;  %v489_v34 = vrot.slane %v2487_v7, 7  ;;  %v3387_v39 = vsel %vm2524_vm8, 4294967295, %v3386_v39  ;;  %v148_v0 = vand.u32 15, %v2500_v18 }
  0xd9   :  { %v472_v12 = vmax.f32 %v424_v5, 0.0  ;;  %v445_v20 = vadd.f32 %v2071_v9, %v2411_v16  ;;  %2140 = vrot.lane.b32.xlu0 %v2139_v10, %s2304_s3  ;;  %v592_v23 = vsel %vm3363_vm2, %v567_v62, %v568_v4  ;;  %v2511_v24 = vsel %vm3362_vm3, %v486_v38, %v487_v3 }
  0xda   :  { %v436_v22 = vpop.f32.mrf.mxu0  ;;  %v490_v30 = vrot.slane %v2489_v8, 7  ;;  %2145 = vrot.lane.b32.xlu1 %v2144_v21, %s2305_s17  ;;  %v632_v33 = vsel %vm2444_vm5, %v592_v23, 0.0  ;;  %v571_v35 = vrot.slane %v2489_v8, 1  ;;  %v2154_v63 = vpack.i.bf16 %v2489_v8, %v2487_v7 }
  0xdb   :  { %v488_v25 = vrot.slane %v472_v12, 7  ;;  %v569_v26 = vrot.slane %v472_v12, 1  ;;  %v437_v27 = vadd.f32 %v2411_v16, %v436_v22  ;;  %v2159_v32 = vpack.i.bf16 %v472_v12, %v471_v58 }
  0xdc   :  { %v2072_v31 = vpop.f32.mrf.mxu0  ;;  %v2528_v41 = vmax.f32 %v445_v20, 0.0  ;;  %v2149_v42 = vpack.i.bf16 %v632_v33, %v593_v28  ;;  %v2549_v58 = vsel %vm3362_vm3, %v489_v34, %v490_v30  ;;  %v589_v9 = vsel %vm3363_vm2, %v570_v29, %v571_v35 }
  0xdd   :  { %v475_v37 = vmax.f32 %v437_v27, 0.0  ;;  %v448_v38 = vadd.f32 %v2072_v31, %v2411_v16  ;;  %2160 = vrot.lane.b32.xlu0 %v2159_v32, %s2304_s3  ;;  %v590_v45 = vsel %vm3363_vm2, %v569_v26, %v570_v29  ;;  %v2535_v47 = vsel %vm3362_vm3, %v487_v3, %v488_v25 }
  0xde   :  { %v439_v43 = vpop.f32.mrf.mxu0  ;;  %v591_v50 = vsel %vm3363_vm2, %v568_v4, %v569_v26  ;;  %2150 = vrot.lane.b32.xlu1 %v2149_v42, %s2305_s17  ;;  %v634_v54 = vsel %vm2463_vm6, %v590_v45, 0.0  ;;  %v2553_v59 = vsel %vm3362_vm3, %v488_v25, %v489_v34  ;;  %v574_v3 = vrot.slane %v2528_v41, 1 }
  0xdf   :  { %v491_v48 = vrot.slane %v475_v37, 7  ;;  %v572_v49 = vrot.slane %v475_v37, 1  ;;  %v440_v46 = vadd.f32 %v2411_v16, %v439_v43  ;;  %v478_v51 = vmax.f32 %v448_v38, 0.0 }
  0xe0   :  { %v2075_v53 = vpop.f32.mrf.mxu0  ;;  %v2164_v4 = vpack.i.bf16 %v634_v54, %v591_v50  ;;  %v493_v10 = vrot.slane %v2528_v41, 7  ;;  %vm2588_vm10 = vcmp.ne.s32.totalorder %v148_v0, 15 }
  0xe1   :  { %v476_v61 = vmax.f32 %v440_v46, 0.0  ;;  %v461_v62 = vadd.f32 %v2075_v53, %v2411_v16  ;;  %v588_v6 = vsel %vm3363_vm2, %v571_v35, %v572_v49  ;;  %v494_v20 = vrot.slane %v478_v51, 7 }
  0xe2   :  { %v452_v5 = vpop.f32.mrf.mxu0  ;;  %2165 = vrot.lane.b32.xlu0 %v2164_v4, %s2305_s17  ;;  %2155 = vrot.lane.b32.xlu1 %v2154_v63, %s2304_s3  ;;  %v636_v18 = vsel %vm2495_vm7, %v588_v6, 0.0  ;;  %v2572_v21 = vsel %vm3362_vm3, %v490_v30, %v491_v48  ;;  %v575_v22 = vrot.slane %v478_v51, 1  ;;  %v2174_v46 = vpack.i.bf16 %v478_v51, %v2528_v41 }
  0xe3   :  { %v492_v11 = vrot.slane %v476_v61, 7  ;;  %v573_v12 = vrot.slane %v476_v61, 1  ;;  %v453_v17 = vadd.f32 %v2411_v16, %v452_v5  ;;  %v2179_v8 = vpack.i.bf16 %v476_v61, %v475_v37 }
  0xe4   :  { %v2076_v7 = vpop.f32.mrf.mxu0  ;;  %v481_v23 = vmax.f32 %v461_v62, 0.0  ;;  %v2169_v27 = vpack.i.bf16 %v636_v18, %v589_v9  ;;  %v2594_v42 = vsel %vm3362_vm3, %v493_v10, %v494_v20  ;;  %v585_v53 = vsel %vm3363_vm2, %v574_v3, %v575_v22 }
  0xe5   :  { %v479_v25 = vmax.f32 %v453_v17, 0.0  ;;  %v464_v26 = vadd.f32 %v2076_v7, %v2411_v16  ;;  %v586_v29 = vsel %vm3363_vm2, %v573_v12, %v574_v3  ;;  %v587_v31 = vsel %vm3363_vm2, %v572_v49, %v573_v12  ;;  %v3221_v17 = vld [vmem:[%s3359_s7] ss:$0 sm:$0xff]  ;;  %s2307_s7 = smov [#allocation3]  }
  0xe6   :  { %v455_v28 = vpop.f32.mrf.mxu0  ;;  %v2581_v32 = vsel %vm3362_vm3, %v491_v48, %v492_v11  ;;  %2180 = vrot.lane.b32.xlu0 %v2179_v8, %s2304_s3  ;;  %2170 = vrot.lane.b32.xlu1 %v2169_v27, %s2305_s17  ;;  %v638_v37 = vsel %vm2524_vm8, %v586_v29, 0.0  ;;  %v2598_v43 = vsel %vm3362_vm3, %v492_v11, %v493_v10  ;;  %v497_v61 = vrot.slane %v481_v23, 7 }
  0xe7   :  { %v495_v33 = vrot.slane %v479_v25, 7  ;;  %v576_v30 = vrot.slane %v479_v25, 1  ;;  %v482_v34 = vmax.f32 %v464_v26, 0.0  ;;  %v456_v35 = vadd.f32 %v2411_v16, %v455_v28 }
  0xe8   :  { %v578_v16 = vrot.slane %v481_v23, 1  ;;  %v2184_v49 = vpack.i.bf16 %v638_v37, %v587_v31  ;;  %v162_v5 = vand.u32 15, %v2503_v19  ;;  %v57_v26 = vand.u32 15, %v2406_v15 }
  0xe9   :  { %v498_v45 = vrot.slane %v482_v34, 7  ;;  %v480_v48 = vmax.f32 %v456_v35, 0.0  ;;  %v584_v50 = vsel %vm3363_vm2, %v575_v22, %v576_v30  ;;  %v2607_v54 = vsel %vm3362_vm3, %v494_v20, %v495_v33 }
  0xea   :  { %v640_v0 = vsel %vm2543_vm9, %v584_v50, 0.0  ;;  %v579_v4 = vrot.slane %v482_v34, 1  ;;  %2185 = vrot.lane.b32.xlu0 %v2184_v49, %s2305_s17  ;;  %2175 = vrot.lane.b32.xlu1 %v2174_v46, %s2304_s3  ;;  %vm2638_vm11 = vcmp.ne.s32.totalorder %v162_v5, 15  ;;  %v2194_v7 = vpack.i.bf16 %v482_v34, %v481_v23 }
  0xeb   :  { %v496_v62 = vrot.slane %v480_v48, 7  ;;  %v577_v63 = vrot.slane %v480_v48, 1  ;;  %v2199_v41 = vpack.i.bf16 %v480_v48, %v479_v25  ;;  %v2189_v51 = vpack.i.bf16 %v640_v0, %v585_v53 }
  0xec   :  { %v515_v9 = vsel %vm3362_vm3, %v498_v45, %v483_v52  ;;  %v2630_v19 = vsel %vm3362_vm3, %v497_v61, %v498_v45  ;;  %v596_v20 = vsel %vm3363_vm2, %v579_v4, %v564_v57  ;;  %v581_v8 = vsel %vm3363_vm2, %v578_v16, %v579_v4 }
  0xed   :  { %v582_v3 = vsel %vm3363_vm2, %v577_v63, %v578_v16  ;;  %v583_v6 = vsel %vm3363_vm2, %v576_v30, %v577_v63  ;;  %v2626_v11 = vsel %vm3362_vm3, %v495_v33, %v496_v62  ;;  %v2634_v12 = vsel %vm3362_vm3, %v496_v62, %v497_v61 }
  0xee   :  { %v642_v10 = vsel %vm2588_vm10, %v582_v3, 0.0  ;;  %2200 = vrot.lane.b32.xlu0 %v2199_v41, %s2304_s3  ;;  %2190 = vrot.lane.b32.xlu1 %v2189_v51, %s2305_s17  ;;  %v644_v18 = vsel %vm2638_vm11, %v596_v20, 0.0  ;;  %v39_v25 = vadd.s32 16, %v2406_v15  ;;  %v41_v57 = vadd.s32 32, %v2406_v15 }
  0xef   :  { %v2204_v52 = vpack.i.bf16 %v642_v10, %v583_v6  ;;  %v2209_v22 = vpack.i.bf16 %v644_v18, %v581_v8  ;;  %vm2656_vm12 = vcmp.ne.s32.totalorder %v57_v26, 0  ;;  %v43_v34 = vadd.s32 48, %v2406_v15 }
  0xf0   :  { %v71_v23 = vand.u32 15, %v39_v25  ;;  %v85_v30 = vand.u32 15, %v41_v57  ;;  %v548_v45 = vsel %vm2656_vm12, %v515_v9, 0.0  ;;  %v3398_v63 = vmov 0 }
  0xf1   :  { %v99_v41 = vand.u32 15, %v43_v34  ;;  %v47_v25 = vadd.s32 80, %v2406_v15 }
  0xf2   :  { %2205 = vrot.lane.b32.xlu0 %v2204_v52, %s2305_s17  ;;  %2195 = vrot.lane.b32.xlu1 %v2194_v7, %s2304_s3  ;;  %vm2661_vm15 = vcmp.ne.s32.totalorder %v71_v23, 0  ;;  %vm2672_vm1 = vcmp.ne.s32.totalorder %v85_v30, 0 }
  0xf3   :  { %v3399_v63 = vsel %vm2672_vm1, 4294967295, %v3398_v63  ;;  %v550_v51 = vsel %vm2661_vm15, %v2474_v1, 0.0  ;;  %vm2686_vm3 = vcmp.ne.s32.totalorder %v99_v41, 0  ;;  %v3400_v1 = vmov 0 }
  0xf4   :  { %v3401_v1 = vsel %vm2686_vm3, 4294967295, %v3400_v1 }
  0xf6   :  { %2210 = vrot.lane.b32.xlu1 %v2209_v22, %s2305_s17 }
 0x147   :  { %v2136_v36 = vpop.permute.xlu0 %2135 }
 0x148   :  { %v2138_v27 = vunpack.i.h.bf16 %v2136_v36  ;;  %v2137_v28 = vunpack.i.l.bf16 %v2136_v36 }
 0x14a   :  { %v774_v50 = vsel %vm3371_vm13, %v548_v45, %v2137_v28  ;;  %v775_v53 = vsel %vm3371_vm13, %v2480_v2, %v2138_v27  ;;  %v45_v2 = vadd.s32 64, %v2406_v15  ;;  %v49_v45 = vadd.s32 96, %v2406_v15 }
 0x14b   :  { %v2141_v29 = vpop.permute.xlu0 %2140 }
 0x14c   :  { %v2146_v33 = vpop.permute.xlu1 %2145  ;;  %v2143_v48 = vunpack.i.h.bf16 %v2141_v29  ;;  %v2142_v49 = vunpack.i.l.bf16 %v2141_v29  ;;  %v113_v57 = vand.u32 15, %v45_v2 }
 0x14d   :  { %v2148_v37 = vunpack.i.h.bf16 %v2146_v33  ;;  %v2147_v16 = vunpack.i.l.bf16 %v2146_v33 }
 0x14e   :  { %v776_v6 = vsel %vm3371_vm13, %v550_v51, %v2142_v49  ;;  %v777_v9 = vsel %vm3371_vm13, %v2459_v56, %v2143_v48  ;;  %v552_v56 = vsel %vm2672_vm1, %v2511_v24, 0.0  ;;  %v127_v24 = vand.u32 15, %v47_v25 }
 0x14f   :  { %v2161_v46 = vpop.permute.xlu0 %2160  ;;  %v791_v61 = vsel %vm3372_vm14, %v774_v50, %v2147_v16  ;;  %v792_v62 = vsel %vm3372_vm14, %v775_v53, %v2148_v37  ;;  %v554_v48 = vsel %vm2686_vm3, %v2553_v59, 0.0  ;;  %vm2704_vm2 = vcmp.ne.s32.totalorder %v113_v57, 0 }
 0x150   :  { %v2151_v0 = vpop.permute.xlu1 %2150  ;;  %v807_v4 = vpack.c.bf16 %v792_v62, %v791_v61  ;;  %v2163_v10 = vunpack.i.h.bf16 %v2161_v46  ;;  %v2162_v52 = vunpack.i.l.bf16 %v2161_v46  ;;  %vm2714_vm1 = vcmp.ne.s32.totalorder %v127_v24, 0 }
 0x151   :  { %v2153_v5 = vunpack.i.h.bf16 %v2151_v0  ;;  %v2152_v3 = vunpack.i.l.bf16 %v2151_v0  ;;  %v3404_v51 = vmov 0 }
 0x152   :  { %2089 = vmatprep.mubr.msk.bf16.mxu1 %vm3370_vm0, %v807_v4  ;;  %v778_v23 = vsel %vm3371_vm13, %v552_v56, %v2162_v52  ;;  %v779_v27 = vsel %vm3371_vm13, %v2535_v47, %v2163_v10  ;;  %v3402_v47 = vmov 0  ;;  %v3405_v51 = vsel %vm2714_vm1, 4294967295, %v3404_v51 }
 0x153   :  { %v794_v20 = vsel %vm3372_vm14, %v777_v9, %v2153_v5  ;;  %v793_v7 = vsel %vm3372_vm14, %v776_v6, %v2152_v3  ;;  %v3403_v47 = vsel %vm2704_vm2, 4294967295, %v3402_v47  ;;  %v141_v3 = vand.u32 15, %v49_v45 }
 0x154   :  { %v808_v8 = vpack.c.bf16 %v794_v20, %v793_v7  ;;  %v2166_v18 = vpop.permute.xlu0 %2165  ;;  %v2156_v22 = vpop.permute.xlu1 %2155  ;;  %v51_v9 = vadd.s32 112, %v2406_v15 }
 0x155   :  { %v2168_v36 = vunpack.i.h.bf16 %v2166_v18  ;;  %v2167_v26 = vunpack.i.l.bf16 %v2166_v18  ;;  %v2158_v28 = vunpack.i.h.bf16 %v2156_v22  ;;  %v2157_v29 = vunpack.i.l.bf16 %v2156_v22 }
 0x156   :  { %2090 = vmatmul.mubr.msk.bf16.vlgmr.msra.gmra.mxu1 %vm3370_vm0, %v808_v8  ;;  %vm2728_vm3 = vcmp.ne.s32.totalorder %v141_v3, 0  ;;  %v155_v57 = vand.u32 15, %v51_v9  ;;  %v2273_v9 = vld [vmem:[%s3357_s5 + $0x20] sm:$0xff]  }
 0x157   :  { %v796_v33 = vsel %vm3372_vm14, %v779_v27, %v2168_v36  ;;  %v795_v30 = vsel %vm3372_vm14, %v778_v23, %v2167_v26  ;;  %v781_v50 = vsel %vm3371_vm13, %v2549_v58, %v2158_v28  ;;  %v780_v53 = vsel %vm3371_vm13, %v554_v48, %v2157_v29 }
 0x158   :  { %v809_v34 = vpack.c.bf16 %v796_v33, %v795_v30  ;;  %v2181_v37 = vpop.permute.xlu0 %2180  ;;  %v2171_v16 = vpop.permute.xlu1 %2170  ;;  %v556_v58 = vsel %vm2704_vm2, %v2572_v21, 0.0 }
 0x159   :  { %v2173_v49 = vunpack.i.h.bf16 %v2171_v16  ;;  %v2172_v46 = vunpack.i.l.bf16 %v2171_v16  ;;  %v2183_v61 = vunpack.i.h.bf16 %v2181_v37  ;;  %v2182_v62 = vunpack.i.l.bf16 %v2181_v37 }
 0x15a   :  { %2093 = vmatprep.mubr.msk.bf16.mxu1 %vm3370_vm0, %v809_v34 }
 0x15b   :  { %v797_v0 = vsel %vm3372_vm14, %v780_v53, %v2172_v46  ;;  %v798_v4 = vsel %vm3372_vm14, %v781_v50, %v2173_v49  ;;  %v783_v10 = vsel %vm3371_vm13, %v2581_v32, %v2183_v61  ;;  %v782_v52 = vsel %vm3371_vm13, %v556_v58, %v2182_v62 }
 0x15c   :  { %v810_v59 = vpack.c.bf16 %v798_v4, %v797_v0  ;;  %v2186_v41 = vpop.permute.xlu0 %2185  ;;  %v2176_v5 = vpop.permute.xlu1 %2175  ;;  %v558_v32 = vsel %vm2714_vm1, %v2598_v43, 0.0  ;;  %v560_v43 = vsel %vm2728_vm3, %v2607_v54, 0.0  ;;  %vm2744_vm1 = vcmp.ne.s32.totalorder %v155_v57, 0  ;;  %v2281_v57 = vld [vmem:[%s3357_s5 + $0x40] sm:$0xff]  }
 0x15d   :  { %v2188_v2 = vunpack.i.h.bf16 %v2186_v41  ;;  %v2187_v6 = vunpack.i.l.bf16 %v2186_v41  ;;  %v2178_v20 = vunpack.i.h.bf16 %v2176_v5  ;;  %v2177_v7 = vunpack.i.l.bf16 %v2176_v5 }
 0x15e   :  { %2094 = vmatmul.mubr.msk.bf16.gmra.mxu1 %vm3370_vm0, %v810_v59  ;;  %v562_v0 = vsel %vm2744_vm1, %v2634_v12, 0.0  ;;  %v2270_v12 = vld [vmem:[%s3357_s5 + $0x38] sm:$0xff]  }
 0x15f   :  { %v799_v8 = vsel %vm3372_vm14, %v782_v52, %v2187_v6  ;;  %v800_v18 = vsel %vm3372_vm14, %v783_v10, %v2188_v2  ;;  %v785_v23 = vsel %vm3371_vm13, %v2594_v42, %v2178_v20  ;;  %v784_v27 = vsel %vm3371_vm13, %v558_v32, %v2177_v7  ;;  %v2272_v6 = vld [vmem:[%s3357_s5 + $0x28] sm:$0xff]   ;;  %v2274_v10 = vld [vmem:[%s3357_s5 + $0x18] sm:$0xff]   ;;  %v2275_v52 = vld [vmem:[%s3357_s5 + $0x10] sm:$0xff]  }
 0x160   :  { %v811_v22 = vpack.c.bf16 %v800_v18, %v799_v8  ;;  %v2201_v25 = vpop.permute.xlu0 %2200  ;;  %v2191_v56 = vpop.permute.xlu1 %2190  ;;  %v3408_v42 = vmov 0  ;;  %v2306_v2 = vmov 0   ;;  %v2276_v20 = vld [vmem:[%s3357_s5 + $0x8] sm:$0xff]   ;;  %v2277_v7 = vld [vmem:[%s3357_s5] sm:$0xff]   ;;  %v2278_v8 = vld [vmem:[%s3357_s5 + $0x58] sm:$0xff]  }
 0x161   :  { %v2193_v36 = vunpack.i.h.bf16 %v2191_v56  ;;  %v2192_v26 = vunpack.i.l.bf16 %v2191_v56  ;;  %v2203_v28 = vunpack.i.h.bf16 %v2201_v25  ;;  %v2202_v29 = vunpack.i.l.bf16 %v2201_v25  ;;  %1327 = vmatprep.subr.bf16.mxu0 %v2306_v2  ;;  %2105 = vmatprep.subr.bf16.mxu1 %v2306_v2  ;;  %v2279_v18 = vld [vmem:[%s3357_s5 + $0x50] sm:$0xff]   ;;  %v2280_v25 = vld [vmem:[%s3357_s5 + $0x48] sm:$0xff]  }
 0x162   :  { %2097 = vmatprep.mubr.msk.bf16.mxu1 %vm3370_vm0, %v811_v22  ;;  %v3409_v42 = vsel %vm2744_vm1, 4294967295, %v3408_v42  ;;  %1328 = vmatpush1.bf16.msra.mxu0 %v2270_v12  ;;  %v2797_v22 = vld [vmem:[%s3356_s4] ss:$0 sm:$0xff] }
 0x163   :  { %v801_v33 = vsel %vm3372_vm14, %v784_v27, %v2192_v26  ;;  %v802_v30 = vsel %vm3372_vm14, %v785_v23, %v2193_v36  ;;  %v787_v48 = vsel %vm3371_vm13, %v2626_v11, %v2203_v28  ;;  %v786_v49 = vsel %vm3371_vm13, %v560_v43, %v2202_v29  ;;  %2117 = vmatpush1.bf16.msra.mxu1 %v2270_v12 }
 0x164   :  { %v812_v34 = vpack.c.bf16 %v802_v30, %v801_v33  ;;  %v2206_v37 = vpop.permute.xlu0 %2205  ;;  %v2196_v16 = vpop.permute.xlu1 %2195  ;;  %1329 = vmatprep.subr.bf16.mxu0 %v2306_v2  ;;  %2106 = vmatprep.subr.bf16.mxu1 %v2306_v2 }
 0x165   :  { %v2208_v24 = vunpack.i.h.bf16 %v2206_v37  ;;  %v2207_v45 = vunpack.i.l.bf16 %v2206_v37  ;;  %v2198_v46 = vunpack.i.h.bf16 %v2196_v16  ;;  %v2197_v50 = vunpack.i.l.bf16 %v2196_v16  ;;  %2254 = vset.pattern.permute.xlu1 %v2306_v2  ;;  %2255 = vset.pattern.permute.xlu0 %v2306_v2 }
 0x166   :  { %2098 = vmatmul.mubr.msk.bf16.gmra.mxu1 %vm3370_vm0, %v812_v34 }
 0x167   :  { %v803_v53 = vsel %vm3372_vm14, %v786_v49, %v2207_v45  ;;  %v804_v61 = vsel %vm3372_vm14, %v787_v48, %v2208_v24  ;;  %v789_v11 = vsel %vm3371_vm13, %v2630_v19, %v2198_v46  ;;  %v788_v41 = vsel %vm3371_vm13, %v562_v0, %v2197_v50  ;;  %v2271_v19 = vld [vmem:[%s3357_s5 + $0x30] sm:$0xff]  }
 0x168   :  { %v813_v54 = vpack.c.bf16 %v804_v61, %v803_v53  ;;  %v2211_v62 = vpop.permute.xlu1 %2210  ;;  %1330 = vmatpush1.bf16.msra.mxu0 %v2271_v19  ;;  %2118 = vmatpush1.bf16.msra.mxu1 %v2271_v19  ;;  %vm3411_vm13 = vcmp.lt.s32.totalorder %v2406_v15, 1 }
 0x169   :  { %v2213_v4 = vunpack.i.h.bf16 %v2211_v62  ;;  %v2212_v59 = vunpack.i.l.bf16 %v2211_v62  ;;  %1331 = vmatprep.subr.bf16.mxu0 %v2306_v2  ;;  %2107 = vmatprep.subr.bf16.mxu1 %v2306_v2 }
 0x16a   :  { %2101 = vmatprep.mubr.msk.bf16.mxu1 %vm3370_vm0, %v813_v54 }
 0x16b   :  { %v805_v5 = vsel %vm3372_vm14, %v788_v41, %v2212_v59  ;;  %v806_v3 = vsel %vm3372_vm14, %v789_v11, %v2213_v4 }
 0x16c   :  { %v814_v58 = vpack.c.bf16 %v806_v3, %v805_v5  ;;  %1332 = vmatpush1.bf16.msra.mxu0 %v2272_v6  ;;  %2119 = vmatpush1.bf16.msra.mxu1 %v2272_v6 }
 0x16d   :  { %1333 = vmatprep.subr.bf16.mxu0 %v2306_v2  ;;  %2108 = vmatprep.subr.bf16.mxu1 %v2306_v2 }
 0x16e   :  { %2102 = vmatmul.mubr.msk.bf16.gmra.mxu1 %vm3370_vm0, %v814_v58  ;;  %vm3410_vm0 = vcmp.lt.s32.totalorder %v2406_v15, 7 }
 0x16f   :  { %vm3412_vm14 = vmmov %vm3410_vm0 }
 0x170   :  { %1334 = vmatpush1.bf16.msra.mxu0 %v2273_v9  ;;  %2120 = vmatpush1.bf16.msra.mxu1 %v2273_v9  ;;  %vm3413_vm1 = vmmov %vm3410_vm0 }
 0x171   :  { %1335 = vmatprep.subr.bf16.mxu0 %v2306_v2  ;;  %2109 = vmatprep.subr.bf16.mxu1 %v2306_v2 }
 0x174   :  { %1336 = vmatpush1.bf16.msra.mxu0 %v2274_v10  ;;  %2121 = vmatpush1.bf16.msra.mxu1 %v2274_v10 }
 0x175   :  { %1337 = vmatprep.subr.bf16.mxu0 %v2306_v2  ;;  %2110 = vmatprep.subr.bf16.mxu1 %v2306_v2 }
 0x178   :  { %1338 = vmatpush1.bf16.msra.mxu0 %v2275_v52  ;;  %2122 = vmatpush1.bf16.msra.mxu1 %v2275_v52 }
 0x179   :  { %1339 = vmatprep.subr.bf16.mxu0 %v2306_v2  ;;  %2111 = vmatprep.subr.bf16.mxu1 %v2306_v2 }
 0x17c   :  { %1340 = vmatpush1.bf16.msra.mxu0 %v2276_v20  ;;  %2123 = vmatpush1.bf16.msra.mxu1 %v2276_v20 }
 0x17d   :  { %1341 = vmatprep.subr.bf16.mxu0 %v2306_v2  ;;  %2112 = vmatprep.subr.bf16.mxu1 %v2306_v2 }
 0x180   :  { %1342 = vmatpush1.bf16.msra.mxu0 %v2277_v7  ;;  %2124 = vmatpush1.bf16.msra.mxu1 %v2277_v7 }
 0x181   :  { %1351 = vmatprep.subr.bf16.mxu0 %v2306_v2  ;;  %2113 = vmatprep.subr.bf16.mxu1 %v2306_v2 }
 0x184   :  { %1352 = vmatpush2.bf16.msra.mxu0 %v2278_v8  ;;  %2125 = vmatpush2.bf16.msra.mxu1 %v2278_v8 }
 0x185   :  { %1353 = vmatprep.subr.bf16.mxu0 %v2306_v2  ;;  %2114 = vmatprep.subr.bf16.mxu1 %v2306_v2 }
 0x188   :  { %1354 = vmatpush2.bf16.msra.mxu0 %v2279_v18  ;;  %2126 = vmatpush2.bf16.msra.mxu1 %v2279_v18 }
 0x189   :  { %1355 = vmatprep.subr.bf16.mxu0 %v2306_v2  ;;  %2115 = vmatprep.subr.bf16.mxu1 %v2306_v2 }
 0x18c   :  { %1356 = vmatpush2.bf16.msra.mxu0 %v2280_v25  ;;  %2127 = vmatpush2.bf16.msra.mxu1 %v2280_v25 }
 0x18d   :  { %1357 = vmatprep.subr.bf16.mxu0 %v2306_v2  ;;  %2116 = vmatprep.subr.bf16.mxu1 %v2306_v2 }
 0x190   :  { %1358 = vmatpush2.bf16.msra.mxu0 %v2281_v57  ;;  %2128 = vmatpush2.bf16.msra.mxu1 %v2281_v57 }
 0x216   :  { %v2091_v56 = vpop.f32.mrf.mxu1 }
 0x217   :  { %v938_v32 = vadd.f32 %v2091_v56, %v2797_v22 }
 0x218   :  { %v929_v36 = vpop.f32.mrf.mxu1 }
 0x219   :  { %v930_v26 = vadd.f32 %v2797_v22, %v929_v36  ;;  %v994_v28 = vmax.f32 %v938_v32, 0.0 }
 0x21a   :  { %v2092_v23 = vpop.f32.mrf.mxu1 }
 0x21b   :  { %v941_v27 = vadd.f32 %v2092_v23, %v2797_v22  ;;  %v2808_v33 = vmax.f32 %v930_v26, 0.0  ;;  %v1010_v48 = vrot.slane %v994_v28, 7  ;;  %v1058_v49 = vrot.slane %v994_v28, 1 }
 0x21c   :  { %v932_v29 = vpop.f32.mrf.mxu1 }
 0x21d   :  { %v995_v30 = vmax.f32 %v941_v27, 0.0  ;;  %v933_v34 = vadd.f32 %v2797_v22, %v932_v29  ;;  %v1008_v53 = vrot.slane %v2808_v33, 7  ;;  %v1056_v0 = vrot.slane %v2808_v33, 1 }
 0x21e   :  { %v2095_v37 = vpop.f32.mrf.mxu1 }
 0x21f   :  { %v1011_v16 = vrot.slane %v995_v30, 7  ;;  %v1059_v43 = vrot.slane %v995_v30, 1  ;;  %v993_v24 = vmax.f32 %v933_v34, 0.0  ;;  %v954_v45 = vadd.f32 %v2095_v37, %v2797_v22 }
 0x220   :  { %v945_v46 = vpop.f32.mrf.mxu1  ;;  %v2219_v50 = vpack.i.bf16 %v995_v30, %v994_v28 }
 0x221   :  { %v1009_v61 = vrot.slane %v993_v24, 7  ;;  %v1057_v54 = vrot.slane %v993_v24, 1  ;;  %v946_v62 = vadd.f32 %v2797_v22, %v945_v46  ;;  %v2214_v59 = vpack.i.bf16 %v993_v24, %v2808_v33 }
 0x222   :  { %2220 = vrot.lane.b32.xlu1 %v2219_v50, %s2305_s17  ;;  %v2096_v4 = vpop.f32.mrf.mxu1  ;;  %v1084_v11 = vsel %vm3410_vm0, %v1058_v49, %v1059_v43  ;;  %v2821_v41 = vsel %vm3411_vm13, %v1010_v48, %v1011_v16  ;;  %v998_v5 = vmax.f32 %v954_v45, 0.0  ;;  %vm3414_vm0 = vmmov %vm3411_vm13 }
 0x223   :  { %v996_v3 = vmax.f32 %v946_v62, 0.0  ;;  %v957_v58 = vadd.f32 %v2096_v4, %v2797_v22  ;;  %2215 = vrot.lane.b32.xlu0 %v2214_v59, %s2305_s17  ;;  %v1085_v2 = vsel %vm3412_vm14, %v1057_v54, %v1058_v49  ;;  %v1086_v19 = vsel %vm3413_vm1, %v1056_v0, %v1057_v54  ;;  %vm3415_vm14 = vmmov %vm3413_vm1 }
 0x224   :  { %v948_v12 = vpop.f32.mrf.mxu1  ;;  %v2835_v6 = vsel %vm3411_vm13, %v1008_v53, %v1009_v61  ;;  %v2839_v9 = vsel %vm3414_vm0, %v1009_v61, %v1010_v48  ;;  %v1089_v18 = vsel %vm2439_vm4, %v1085_v2, 0.0  ;;  %v1062_v25 = vrot.slane %v998_v5, 1  ;;  %vm3416_vm1 = vmmov %vm3414_vm0 }
 0x225   :  { %v1012_v10 = vrot.slane %v996_v3, 7  ;;  %v1060_v52 = vrot.slane %v996_v3, 1  ;;  %v999_v20 = vmax.f32 %v957_v58, 0.0  ;;  %v949_v7 = vadd.f32 %v2797_v22, %v948_v12  ;;  %vm3418_vm0 = vmmov %vm3415_vm14 }
 0x226   :  { %v2099_v8 = vpop.f32.mrf.mxu1  ;;  %v1185_v26 = vpack.c.bf16 %v1089_v18, %v1086_v19  ;;  %vm3417_vm13 = vcmask 523264   ;;  %v1014_v49 = vrot.slane %v998_v5, 7 }
 0x227   :  { %v1063_v56 = vrot.slane %v999_v20, 1  ;;  %v997_v32 = vmax.f32 %v949_v7, 0.0  ;;  %v970_v36 = vadd.f32 %v2099_v8, %v2797_v22  ;;  %v2229_v23 = vpack.i.bf16 %v999_v20, %v998_v5 }
 0x228   :  { %v961_v57 = vpop.f32.mrf.mxu1  ;;  %v1083_v27 = vsel %vm3415_vm14, %v1059_v43, %v1060_v52  ;;  %v2849_v28 = vsel %vm3416_vm1, %v1011_v16, %v1012_v10  ;;  %v1015_v37 = vrot.slane %v999_v20, 7  ;;  %2026 = vmatprep.mubr.msk.bf16.mxu0 %vm3417_vm13, %v1185_v26  ;;  %vm3419_vm14 = vmmov %vm3418_vm0  ;;  %vm3421_vm13 = vcmp.lt.s32.totalorder %v2406_v15, 1 }
 0x229   :  { %v1013_v29 = vrot.slane %v997_v32, 7  ;;  %v1061_v30 = vrot.slane %v997_v32, 1  ;;  %v962_v34 = vadd.f32 %v2797_v22, %v961_v57  ;;  %2230 = vrot.lane.b32.xlu1 %v2229_v23, %s2305_s17  ;;  %v2224_v45 = vpack.i.bf16 %v997_v32, %v996_v3  ;;  %vm3420_vm1 = vmmov %vm3418_vm0 }
 0x22a   :  { %v2100_v24 = vpop.f32.mrf.mxu1  ;;  %v1091_v48 = vsel %vm2444_vm5, %v1083_v27, 0.0  ;;  %v1080_v43 = vsel %vm3418_vm0, %v1062_v25, %v1063_v56  ;;  %v1002_v16 = vmax.f32 %v970_v36, 0.0  ;;  %vm3422_vm0 = vmmov %vm3421_vm13 }
 0x22b   :  { %v1000_v46 = vmax.f32 %v962_v34, 0.0  ;;  %v973_v50 = vadd.f32 %v2100_v24, %v2797_v22  ;;  %2225 = vrot.lane.b32.xlu0 %v2224_v45, %s2305_s17  ;;  %v2860_v54 = vpack.c.bf16 %v1091_v48, %v1084_v11  ;;  %v1081_v62 = vsel %vm3419_vm14, %v1061_v30, %v1062_v25  ;;  %vm3423_vm14 = vmmov %vm3422_vm0 }
 0x22c   :  { %v964_v61 = vpop.f32.mrf.mxu1  ;;  %v1082_v4 = vsel %vm3420_vm1, %v1060_v52, %v1061_v30  ;;  %v2868_v59 = vsel %vm3421_vm13, %v1012_v10, %v1013_v29  ;;  %v1093_v11 = vsel %vm2463_vm6, %v1081_v62, 0.0  ;;  %v2875_v19 = vsel %vm3422_vm0, %v1014_v49, %v1015_v37  ;;  %vm3424_vm13 = vmmov %vm3422_vm0 }
 0x22d   :  { %v1064_v5 = vrot.slane %v1000_v46, 1  ;;  %v1003_v3 = vmax.f32 %v973_v50, 0.0  ;;  %v965_v58 = vadd.f32 %v2797_v22, %v964_v61  ;;  %v1016_v12 = vrot.slane %v1000_v46, 7  ;;  %vm3425_vm0 = vmmov %vm3420_vm1 }
 0x22e   :  { %v2103_v2 = vpop.f32.mrf.mxu1  ;;  %v2879_v52 = vsel %vm3423_vm14, %v1013_v29, %v1014_v49  ;;  %v1066_v8 = vrot.slane %v1002_v16, 1  ;;  %v2882_v25 = vpack.c.bf16 %v1093_v11, %v1082_v4  ;;  %v1018_v45 = vrot.slane %v1002_v16, 7  ;;  %vm3426_vm14 = vmmov %vm3425_vm0 }
 0x22f   :  { %v1067_v20 = vrot.slane %v1003_v3, 1  ;;  %v1001_v10 = vmax.f32 %v965_v58, 0.0  ;;  %v986_v7 = vadd.f32 %v2103_v2, %v2797_v22  ;;  %v1079_v32 = vsel %vm3420_vm1, %v1063_v56, %v1064_v5  ;;  %vm3427_vm1 = vmmov %vm3425_vm0 }
 0x230   :  { %v977_v18 = vpop.f32.mrf.mxu1  ;;  %v1019_v36 = vrot.slane %v1003_v3, 7  ;;  %v1095_v29 = vsel %vm2495_vm7, %v1079_v32, 0.0  ;;  %v2891_v34 = vsel %vm3424_vm13, %v1015_v37, %v1016_v12 }
 0x231   :  { %v1017_v26 = vrot.slane %v1001_v10, 7  ;;  %v1065_v57 = vrot.slane %v1001_v10, 1  ;;  %v978_v23 = vadd.f32 %v2797_v22, %v977_v18  ;;  %v2234_v30 = vpack.i.bf16 %v1001_v10, %v1000_v46 }
 0x232   :  { %v2104_v27 = vpop.f32.mrf.mxu1  ;;  %v1076_v24 = vsel %vm3425_vm0, %v1066_v8, %v1067_v20  ;;  %v1006_v48 = vmax.f32 %v986_v7, 0.0  ;;  %v2897_v61 = vpack.c.bf16 %v1095_v29, %v1080_v43  ;;  %v2244_v10 = vpack.i.bf16 %v1003_v3, %v1002_v16  ;;  %vm3428_vm0 = vmmov %vm3424_vm13 }
 0x233   :  { %v1004_v56 = vmax.f32 %v978_v23, 0.0  ;;  %v989_v49 = vadd.f32 %v2104_v27, %v2797_v22  ;;  %2235 = vrot.lane.b32.xlu0 %v2234_v30, %s2305_s17  ;;  %v1077_v46 = vsel %vm3426_vm14, %v1065_v57, %v1066_v8  ;;  %v1078_v37 = vsel %vm3427_vm1, %v1064_v5, %v1065_v57  ;;  %vm3429_vm14 = vmmov %vm3428_vm0 }
 0x234   :  { %v980_v50 = vpop.f32.mrf.mxu1  ;;  %v2905_v62 = vsel %vm3424_vm13, %v1016_v12, %v1017_v26  ;;  %v1097_v43 = vsel %vm2524_vm8, %v1077_v46, 0.0  ;;  %v2912_v7 = vsel %vm3428_vm0, %v1018_v45, %v1019_v36  ;;  %v2916_v5 = vsel %vm3429_vm14, %v1017_v26, %v1018_v45  ;;  %vm3430_vm1 = vmmov %vm3428_vm0 }
 0x235   :  { %v1020_v4 = vrot.slane %v1004_v56, 7  ;;  %v1068_v58 = vrot.slane %v1004_v56, 1  ;;  %v1007_v2 = vmax.f32 %v989_v49, 0.0  ;;  %v981_v11 = vadd.f32 %v2797_v22, %v980_v50  ;;  %vm3436_vm7 = vmmov %vm3428_vm0 }
 0x236   :  { %v1070_v32 = vrot.slane %v1006_v48, 1  ;;  %v2923_v16 = vpack.c.bf16 %v1097_v43, %v1078_v37  ;;  %vm3431_vm13 = vcmp.lt.s32.totalorder %v2406_v15, 7  ;;  %v1022_v30 = vrot.slane %v1006_v48, 7 }
 0x237   :  { %v1023_v8 = vrot.slane %v1007_v2, 7  ;;  %v1071_v12 = vrot.slane %v1007_v2, 1  ;;  %v1005_v18 = vmax.f32 %v981_v11, 0.0  ;;  %2245 = vrot.lane.b32.xlu0 %v2244_v10, %s2305_s17  ;;  %v2921_v22 = vsel %vm3430_vm1, %v1019_v36, %v1020_v4  ;;  %vm3432_vm14 = vmmov %vm3431_vm13 }
 0x238   :  { %v1075_v3 = vsel %vm3431_vm13, %v1067_v20, %v1068_v58  ;;  %vm3433_vm1 = vmmov %vm3431_vm13  ;;  %v2249_v46 = vpack.i.bf16 %v1007_v2, %v1006_v48 }
 0x239   :  { %v1021_v57 = vrot.slane %v1005_v18, 7  ;;  %v1069_v23 = vrot.slane %v1005_v18, 1  ;;  %v2239_v27 = vpack.i.bf16 %v1005_v18, %v1004_v56  ;;  %v1039_v26 = vsel %vm3428_vm0, %v1023_v8, %v1008_v53  ;;  %vm3434_vm13 = vmmov %vm3433_vm1 }
 0x23a   :  { %v1072_v29 = vsel %vm3432_vm14, %v1070_v32, %v1071_v12  ;;  %v1087_v36 = vsel %vm3433_vm1, %v1071_v12, %v1056_v0  ;;  %vm3435_vm8 = vmmov %vm3433_vm1  ;;  %v2954_v0 = vsel %vm3428_vm0, %v1022_v30, %v1023_v8  ;;  %v1042_v12 = vsel %vm2661_vm15, %v2839_v9, 0.0 }
 0x23b   :  { %2240 = vrot.lane.b32.xlu1 %v2239_v27, %s2305_s17  ;;  %v1073_v20 = vsel %vm3434_vm13, %v1069_v23, %v1070_v32  ;;  %v1074_v45 = vsel %vm3435_vm8, %v1068_v58, %v1069_v23  ;;  %v2944_v53 = vsel %vm3436_vm7, %v1020_v4, %v1021_v57  ;;  %v1103_v56 = vsel %vm2638_vm11, %v1087_v36, 0.0  ;;  %vm3437_vm14 = vmmov %vm3428_vm0 }
 0x23c   :  { %v1101_v33 = vsel %vm2588_vm10, %v1073_v20, 0.0  ;;  %v2950_v49 = vpack.c.bf16 %v1103_v56, %v1072_v29  ;;  %v2958_v50 = vsel %vm3437_vm14, %v1021_v57, %v1022_v30  ;;  %v1099_v4 = vsel %vm2543_vm9, %v1075_v3, 0.0 }
 0x23d   :  { %v1197_v37 = vpack.c.bf16 %v1101_v33, %v1074_v45  ;;  %v2962_v58 = vpack.c.bf16 %v1099_v4, %v1076_v24  ;;  %vm3438_vm7 = vcmask 523264   ;;  %v1040_v32 = vsel %vm2656_vm12, %v1039_v26, 0.0 }
 0x23e   :  { %vm3439_vm8 = vmmov %vm3438_vm7 }
 0x23f   :  { %2250 = vrot.lane.b32.xlu1 %v2249_v46, %s2305_s17  ;;  %2032 = vmatprep.mubr.msk.bf16.mxu1 %vm3438_vm7, %v1197_v37  ;;  %vm3440_vm1 = vmmov %vm3438_vm7  ;;  %vm3444_vm7 = vnez %v3401_v1 }
 0x240   :  { %vm3441_vm13 = vmmov %vm3440_vm1 }
 0x241   :  { %vm3442_vm0 = vmmov %vm3440_vm1 }
 0x242   :  { %vm3443_vm14 = vmmov %vm3442_vm0 }
 0x294   :  { %v2221_v11 = vpop.permute.xlu1 %2220 }
 0x295   :  { %v2223_v10 = vunpack.i.h.bf16 %v2221_v11  ;;  %v2222_v43 = vunpack.i.l.bf16 %v2221_v11  ;;  %v2216_v8 = vpop.permute.xlu0 %2215 }
 0x296   :  { %v2218_v18 = vunpack.i.h.bf16 %v2216_v8  ;;  %v2217_v48 = vunpack.i.l.bf16 %v2216_v8 }
 0x297   :  { %v1170_v2 = vsel %vm3439_vm8, %v1042_v12, %v2222_v43  ;;  %v1171_v24 = vsel %vm3440_vm1, %v2821_v41, %v2223_v10  ;;  %v1046_v41 = vsel %vm3444_vm7, %v2879_v52, 0.0  ;;  %vm3445_vm8 = vmmov %vm3442_vm0 }
 0x298   :  { %v1186_v3 = vpack.c.bf16 %v1171_v24, %v1170_v2  ;;  %v1168_v57 = vsel %vm3441_vm13, %v1040_v32, %v2217_v48  ;;  %v1169_v23 = vsel %vm3442_vm0, %v2835_v6, %v2218_v18  ;;  %vm3446_vm1 = vmmov %vm3442_vm0  ;;  %vm3447_vm13 = vnez %v3399_v63 }
 0x299   :  { %v1184_v27 = vpack.c.bf16 %v1169_v23, %v1168_v57  ;;  %v1044_v56 = vsel %vm3447_vm13, %v2849_v28, 0.0  ;;  %vm3449_vm7 = vmmov %vm3442_vm0  ;;  %v1052_v32 = vsel %vm2728_vm3, %v2921_v22, 0.0 }
 0x29b   :  { %v2231_v30 = vpop.permute.xlu1 %2230  ;;  %1360 = vmatmul.mubr.bf16.vlgmr.msra.gmra.mxu0 %v1184_v27 }
 0x29c   :  { %v2233_v9 = vunpack.i.h.bf16 %v2231_v30  ;;  %v2232_v29 = vunpack.i.l.bf16 %v2231_v30  ;;  %2027 = vmatprep.mubr.msk.bf16.mxu0 %vm3443_vm14, %v2860_v54  ;;  %vm3448_vm14 = vmmov %vm3442_vm0 }
 0x29d   :  { %v2226_v36 = vpop.permute.xlu0 %2225 }
 0x29e   :  { %v2228_v26 = vunpack.i.h.bf16 %v2226_v36  ;;  %v2227_v20 = vunpack.i.l.bf16 %v2226_v36  ;;  %v1174_v45 = vsel %vm3445_vm8, %v1046_v41, %v2232_v29  ;;  %v1175_v6 = vsel %vm3446_vm1, %v2875_v19, %v2233_v9  ;;  %vm3450_vm8 = vmmov %vm3442_vm0 }
 0x29f   :  { %v1190_v33 = vpack.c.bf16 %v1175_v6, %v1174_v45  ;;  %v1048_v19 = vsel %vm2704_vm2, %v2891_v34, 0.0  ;;  %vm3451_vm1 = vmmov %vm3442_vm0 }
 0x2a0   :  { %v1172_v46 = vsel %vm3442_vm0, %v1044_v56, %v2227_v20  ;;  %v1173_v54 = vsel %vm3448_vm14, %v2868_v59, %v2228_v26  ;;  %vm3453_vm14 = vmmov %vm3442_vm0 }
 0x2a1   :  { %v1188_v37 = vpack.c.bf16 %v1173_v54, %v1172_v46 }
 0x2a3   :  { %1368 = vmatmul.mubr.bf16.gmra.mxu0 %v1186_v3 }
 0x2a4   :  { %2028 = vmatprep.mubr.msk.bf16.mxu0 %vm3449_vm7, %v2882_v25  ;;  %vm3452_vm7 = vnez %v3405_v51 }
 0x2a5   :  { %v2236_v52 = vpop.permute.xlu0 %2235  ;;  %v1050_v25 = vsel %vm3452_vm7, %v2916_v5, 0.0  ;;  %vm3456_vm7 = vmmov %vm3442_vm0 }
 0x2a6   :  { %v2238_v4 = vunpack.i.h.bf16 %v2236_v52  ;;  %v2237_v11 = vunpack.i.l.bf16 %v2236_v52 }
 0x2a8   :  { %v1176_v28 = vsel %vm3450_vm8, %v1048_v19, %v2237_v11  ;;  %v1177_v10 = vsel %vm3451_vm1, %v2905_v62, %v2238_v4  ;;  %vm3454_vm8 = vmmov %vm3442_vm0 }
 0x2a9   :  { %v2246_v43 = vpop.permute.xlu0 %2245  ;;  %v1192_v8 = vpack.c.bf16 %v1177_v10, %v1176_v28  ;;  %vm3455_vm1 = vmmov %vm3442_vm0 }
 0x2aa   :  { %v2248_v59 = vunpack.i.h.bf16 %v2246_v43  ;;  %v2247_v12 = vunpack.i.l.bf16 %v2246_v43  ;;  %vm3461_vm2 = vmmov %vm3455_vm1 }
 0x2ab   :  { %1376 = vmatmul.mubr.bf16.gmra.mxu0 %v1188_v37 }
 0x2ac   :  { %2029 = vmatprep.mubr.msk.bf16.mxu0 %vm3442_vm0, %v2897_v61  ;;  %v1178_v34 = vsel %vm3453_vm14, %v1050_v25, %v2247_v12  ;;  %v1179_v48 = vsel %vm3454_vm8, %v2912_v7, %v2248_v59  ;;  %vm3457_vm0 = vnez %v3409_v42  ;;  %vm3458_vm14 = vmmov %vm3455_vm1 }
 0x2ad   :  { %v2241_v18 = vpop.permute.xlu1 %2240  ;;  %v1194_v24 = vpack.c.bf16 %v1179_v48, %v1178_v34  ;;  %v1054_v7 = vsel %vm3457_vm0, %v2958_v50, 0.0  ;;  %vm3459_vm8 = vmmov %vm3455_vm1  ;;  %v3028_v50 = vld [vmem:[%s3358_s6] ss:$0 sm:$0xff] }
 0x2ae   :  { %v2243_v2 = vunpack.i.h.bf16 %v2241_v18  ;;  %v2242_v62 = vunpack.i.l.bf16 %v2241_v18 }
 0x2b0   :  { %v1180_v3 = vsel %vm3455_vm1, %v1052_v32, %v2242_v62  ;;  %v1181_v5 = vsel %vm3456_vm7, %v2944_v53, %v2243_v2  ;;  %vm3460_vm7 = vmmov %vm3455_vm1 }
 0x2b1   :  { %v1196_v57 = vpack.c.bf16 %v1181_v5, %v1180_v3  ;;  %v2251_v61 = vpop.permute.xlu1 %2250 }
 0x2b2   :  { %v2253_v23 = vunpack.i.h.bf16 %v2251_v61  ;;  %v2252_v27 = vunpack.i.l.bf16 %v2251_v61 }
 0x2b3   :  { %1408 = vmatmul.mubr.bf16.vlgmr.msra.gmra.mxu1 %v1196_v57  ;;  %1384 = vmatmul.mubr.bf16.gmra.mxu0 %v1190_v33 }
 0x2b4   :  { %2033 = vmatprep.mubr.msk.bf16.mxu1 %vm3458_vm14, %v2950_v49  ;;  %v1182_v22 = vsel %vm3459_vm8, %v1054_v7, %v2252_v27  ;;  %v1183_v30 = vsel %vm3455_vm1, %v2954_v0, %v2253_v23  ;;  %2030 = vmatprep.mubr.msk.bf16.mxu0 %vm3460_vm7, %v2923_v16  ;;  %vm3463_vm14 = vcmp.lt.s32.totalorder %v2406_v15, 1 }
 0x2b5   :  { %v1198_v53 = vpack.c.bf16 %v1183_v30, %v1182_v22  ;;  %vm3465_vm1 = vmmov %vm3463_vm14 }
 0x2bb   :  { %1416 = vmatmul.mubr.bf16.gmra.mxu1 %v1198_v53  ;;  %1392 = vmatmul.mubr.bf16.gmra.mxu0 %v1192_v8 }
 0x2bc   :  { %2031 = vmatprep.mubr.msk.bf16.mxu0 %vm3461_vm2, %v2962_v58  ;;  %vm3462_vm2 = vcmp.lt.s32.totalorder %v2406_v15, 7 }
 0x2bd   :  { %vm3464_vm8 = vmmov %vm3462_vm2 }
 0x2be   :  { %vm3466_vm7 = vmmov %vm3462_vm2 }
 0x2c3   :  { %1400 = vmatmul.mubr.bf16.gmra.mxu0 %v1194_v24 }
 0x35b   :  { %v1361_v49 = vpop.f32.mrf.mxu0 }
 0x35c   :  { %v1362_v9 = vadd.f32 %v3028_v50, %v1361_v49 }
 0x35d   :  { %v1363_v29 = vpop.f32.mrf.mxu0 }
 0x35e   :  { %v3031_v0 = vmax.f32 %v1362_v9, 0.0 }
 0x35f   :  { %v1364_v36 = vpop.f32.mrf.mxu0 }
 0x360   :  { %v1365_v16 = vadd.f32 %v3028_v50, %v1364_v36  ;;  %1552 = vrot.lane.b32.xlu0 %v3031_v0, %s2304_s3  ;;  %v1440_v26 = vrot.slane %v3031_v0, 7  ;;  %v1488_v45 = vrot.slane %v3031_v0, 1 }
 0x361   :  { %v1366_v41 = vpop.f32.mrf.mxu0 }
 0x362   :  { %v1425_v58 = vmax.f32 %v1365_v16, 0.0 }
 0x363   :  { %v1369_v20 = vpop.f32.mrf.mxu0 }
 0x364   :  { %v1441_v6 = vrot.slane %v1425_v58, 7  ;;  %v1489_v56 = vrot.slane %v1425_v58, 1  ;;  %v1370_v33 = vadd.f32 %v3028_v50, %v1369_v20  ;;  %1554 = vrot.lane.b32.xlu1 %v1425_v58, %s2304_s3 }
 0x365   :  { %v1371_v46 = vpop.f32.mrf.mxu0 }
 0x366   :  { %v1426_v54 = vmax.f32 %v1370_v33, 0.0  ;;  %v1518_v37 = vsel %vm3462_vm2, %v1488_v45, %v1489_v56  ;;  %v3048_v52 = vsel %vm3463_vm14, %v1440_v26, %v1441_v6  ;;  %vm3467_vm2 = vmmov %vm3465_vm1 }
 0x367   :  { %v1372_v4 = vpop.f32.mrf.mxu0  ;;  %vm3469_vm14 = vmmov %vm3465_vm1 }
 0x368   :  { %v1442_v11 = vrot.slane %v1426_v54, 7  ;;  %v1490_v19 = vrot.slane %v1426_v54, 1  ;;  %v1373_v28 = vadd.f32 %v3028_v50, %v1372_v4  ;;  %1556 = vrot.lane.b32.xlu0 %v1426_v54, %s2304_s3  ;;  %1616 = vrot.lane.b32.xlu1 %v1518_v37, %s2305_s17 }
 0x369   :  { %v1374_v10 = vpop.f32.mrf.mxu0 }
 0x36a   :  { %v1427_v43 = vmax.f32 %v1373_v28, 0.0  ;;  %v1517_v8 = vsel %vm3464_vm8, %v1489_v56, %v1490_v19  ;;  %v3057_v59 = vsel %vm3465_vm1, %v1441_v6, %v1442_v11 }
 0x36b   :  { %v1377_v12 = vpop.f32.mrf.mxu0  ;;  %v1521_v25 = vsel %vm2439_vm4, %v1517_v8, 0.0  ;;  %vm3468_vm4 = vmmov %vm3466_vm7 }
 0x36c   :  { %v1443_v18 = vrot.slane %v1427_v43, 7  ;;  %v1491_v34 = vrot.slane %v1427_v43, 1  ;;  %v1378_v48 = vadd.f32 %v3028_v50, %v1377_v12  ;;  %1618 = vrot.lane.b32.xlu0 %v1521_v25, %s2305_s17  ;;  %1558 = vrot.lane.b32.xlu1 %v1427_v43, %s2304_s3  ;;  %vm3470_vm8 = vmmov %vm3468_vm4 }
 0x36d   :  { %v1379_v2 = vpop.f32.mrf.mxu0 }
 0x36e   :  { %v1428_v62 = vmax.f32 %v1378_v48, 0.0  ;;  %v1516_v24 = vsel %vm3466_vm7, %v1490_v19, %v1491_v34  ;;  %v3068_v32 = vsel %vm3467_vm2, %v1442_v11, %v1443_v18  ;;  %vm3472_vm7 = vmmov %vm3465_vm1 }
 0x36f   :  { %v1380_v3 = vpop.f32.mrf.mxu0  ;;  %vm3473_vm2 = vmmov %vm3465_vm1 }
 0x370   :  { %v1444_v40 = vrot.slane %v1428_v62, 7  ;;  %v1492_v5 = vrot.slane %v1428_v62, 1  ;;  %v1381_v57 = vadd.f32 %v3028_v50, %v1380_v3  ;;  %1620 = vrot.lane.b32.xlu0 %v1516_v24, %s2305_s17  ;;  %1560 = vrot.lane.b32.xlu1 %v1428_v62, %s2304_s3 }
 0x371   :  { %v1382_v61 = vpop.f32.mrf.mxu0 }
 0x372   :  { %v1429_v23 = vmax.f32 %v1381_v57, 0.0  ;;  %v1515_v7 = vsel %vm3468_vm4, %v1491_v34, %v1492_v5  ;;  %v3077_v22 = vsel %vm3469_vm14, %v1443_v18, %v1444_v40  ;;  %vm3476_vm14 = vmmov %vm3465_vm1 }
 0x373   :  { %v1409_v27 = vpop.f32.mrf.mxu1  ;;  %v1385_v30 = vpop.f32.mrf.mxu0  ;;  %v1523_v49 = vsel %vm2444_vm5, %v1515_v7, 0.0  ;;  %vm3471_vm5 = vmmov %vm3468_vm4 }
 0x374   :  { %v1410_v53 = vadd.f32 %v3028_v50, %v1409_v27  ;;  %v1445_v9 = vrot.slane %v1429_v23, 7  ;;  %v1493_v29 = vrot.slane %v1429_v23, 1  ;;  %v1386_v36 = vadd.f32 %v3028_v50, %v1385_v30  ;;  %1622 = vrot.lane.b32.xlu0 %v1523_v49, %s2305_s17  ;;  %1562 = vrot.lane.b32.xlu1 %v1429_v23, %s2304_s3 }
 0x375   :  { %v1411_v16 = vpop.f32.mrf.mxu1  ;;  %v1387_v41 = vpop.f32.mrf.mxu0 }
 0x376   :  { %v1430_v58 = vmax.f32 %v1386_v36, 0.0  ;;  %v1514_v6 = vsel %vm3470_vm8, %v1492_v5, %v1493_v29  ;;  %v3089_v56 = vsel %vm3465_vm1, %v1444_v40, %v1445_v9  ;;  %v3091_v44 = vmax.f32 %v1410_v53, 0.0  ;;  %vm3477_vm8 = vmmov %vm3465_vm1 }
 0x377   :  { %v1412_v20 = vpop.f32.mrf.mxu1  ;;  %v1388_v33 = vpop.f32.mrf.mxu0 }
 0x378   :  { %v1413_v46 = vadd.f32 %v3028_v50, %v1412_v20  ;;  %v1446_v54 = vrot.slane %v1430_v58, 7  ;;  %v1494_v37 = vrot.slane %v1430_v58, 1  ;;  %v1389_v4 = vadd.f32 %v3028_v50, %v1388_v33  ;;  %1624 = vrot.lane.b32.xlu0 %v1514_v6, %s2305_s17  ;;  %1564 = vrot.lane.b32.xlu1 %v1430_v58, %s2304_s3 }
 0x379   :  { %v1414_v11 = vpop.f32.mrf.mxu1  ;;  %v1390_v28 = vpop.f32.mrf.mxu0  ;;  %v1452_v25 = vrot.slane %v3091_v44, 7  ;;  %v1500_v41 = vrot.slane %v3091_v44, 1 }
 0x37a   :  { %v1437_v19 = vmax.f32 %v1413_v46, 0.0  ;;  %v1431_v10 = vmax.f32 %v1389_v4, 0.0  ;;  %v1513_v8 = vsel %vm3471_vm5, %v1493_v29, %v1494_v37  ;;  %v3101_v12 = vsel %vm3472_vm7, %v1445_v9, %v1446_v54 }
 0x37b   :  { %v1417_v43 = vpop.f32.mrf.mxu1  ;;  %v1393_v34 = vpop.f32.mrf.mxu0  ;;  %v1525_v2 = vsel %vm2463_vm6, %v1513_v8, 0.0  ;;  %vm3474_vm6 = vmmov %vm3468_vm4  ;;  %vm3480_vm7 = vnez %v3385_v13 }
 0x37c   :  { %v1453_v18 = vrot.slane %v1437_v19, 7  ;;  %v1418_v48 = vadd.f32 %v3028_v50, %v1417_v43  ;;  %v1447_v62 = vrot.slane %v1431_v10, 7  ;;  %v1495_v24 = vrot.slane %v1431_v10, 1  ;;  %1626 = vrot.lane.b32.xlu0 %v1525_v2, %s2305_s17  ;;  %1576 = vrot.lane.b32.xlu1 %v3091_v44, %s2304_s3  ;;  %vm3475_vm4 = vmmov %vm3465_vm1 }
 0x37d   :  { %v1394_v3 = vadd.f32 %v3028_v50, %v1393_v34  ;;  %v1419_v40 = vpop.f32.mrf.mxu1  ;;  %v1395_v57 = vpop.f32.mrf.mxu0  ;;  %v1501_v30 = vrot.slane %v1437_v19, 1  ;;  %vm3478_vm1 = vmmov %vm3471_vm5 }
 0x37e   :  { %v3111_v5 = vmax.f32 %v1418_v48, 0.0  ;;  %v3115_v61 = vsel %vm3473_vm2, %v1452_v25, %v1453_v18  ;;  %v1512_v27 = vsel %vm3474_vm6, %v1494_v37, %v1495_v24  ;;  %v3121_v7 = vsel %vm3475_vm4, %v1446_v54, %v1447_v62  ;;  %vm3479_vm5 = vmmov %vm3478_vm1 }
 0x37f   :  { %v1432_v23 = vmax.f32 %v1394_v3, 0.0  ;;  %v1420_v60 = vpop.f32.mrf.mxu1  ;;  %v1396_v49 = vpop.f32.mrf.mxu0  ;;  %v1506_v54 = vsel %vm3478_vm1, %v1500_v41, %v1501_v30  ;;  %vm3481_vm6 = vmmov %vm3478_vm1 }
 0x380   :  { %v1454_v53 = vrot.slane %v3111_v5, 7  ;;  %v1397_v36 = vadd.f32 %v3028_v50, %v1396_v49  ;;  %1628 = vrot.lane.b32.xlu0 %v1512_v27, %s2305_s17  ;;  %1566 = vrot.lane.b32.xlu1 %v1431_v10, %s2304_s3  ;;  %v1502_v37 = vrot.slane %v3111_v5, 1  ;;  %vm3482_vm4 = vmmov %vm3473_vm2  ;;  %v1421_v38 = vadd.f32 %v3028_v50, %v1420_v60 }
 0x381   :  { %v1448_v9 = vrot.slane %v1432_v23, 7  ;;  %v1496_v29 = vrot.slane %v1432_v23, 1  ;;  %v1422_v16 = vpop.f32.mrf.mxu1  ;;  %v1398_v58 = vpop.f32.mrf.mxu0 }
 0x382   :  { %v3132_v20 = vsel %vm3476_vm14, %v1453_v18, %v1454_v53  ;;  %v1433_v6 = vmax.f32 %v1397_v36, 0.0  ;;  %vm3483_vm14 = vmmov %vm3473_vm2  ;;  %v3183_v36 = vmax.f32 %v1421_v38, 0.0  ;;  %v1476_v38 = vsel %vm3447_vm13, %v3077_v22, 0.0 }
 0x383   :  { %v3136_v33 = vsel %vm3477_vm8, %v1447_v62, %v1448_v9  ;;  %v1401_v46 = vpop.f32.mrf.mxu0  ;;  %v1511_v11 = vsel %vm3479_vm5, %v1495_v24, %v1496_v29  ;;  %vm3484_vm8 = vmmov %vm3473_vm2  ;;  %vm3486_vm5 = vnez %v3387_v39  ;;  %vm3509_vm13 = vnez %v3401_v1 }
 0x384   :  { %v1449_v4 = vrot.slane %v1433_v6, 7  ;;  %v1402_v44 = vadd.f32 %v3028_v50, %v1401_v46  ;;  %1640 = vrot.lane.b32.xlu0 %v1506_v54, %s2305_s17  ;;  %1578 = vrot.lane.b32.xlu1 %v1437_v19, %s2304_s3  ;;  %v1527_v8 = vsel %vm3480_vm7, %v1511_v11, 0.0  ;;  %v1505_v19 = vsel %vm3481_vm6, %v1501_v30, %v1502_v37  ;;  %vm3487_vm7 = vmmov %vm3478_vm1 }
 0x385   :  { %v1403_v28 = vpop.f32.mrf.mxu0  ;;  %v1497_v24 = vrot.slane %v1433_v6, 1  ;;  %v1533_v3 = vsel %vm2588_vm10, %v1505_v19, 0.0  ;;  %vm3485_vm10 = vmmov %vm3478_vm1  ;;  %v1503_v60 = vrot.slane %v3183_v36, 1  ;;  %v1455_v55 = vrot.slane %v3183_v36, 7 }
 0x386   :  { %v1434_v10 = vmax.f32 %v1402_v44, 0.0  ;;  %v3150_v18 = vsel %vm3473_vm2, %v1448_v9, %v1449_v4  ;;  %vm3488_vm2 = vmmov %vm3478_vm1 }
 0x387   :  { %v1404_v43 = vpop.f32.mrf.mxu0  ;;  %v1510_v30 = vsel %vm3478_vm1, %v1496_v29, %v1497_v24  ;;  %vm3489_vm6 = vmmov %vm3478_vm1 }
 0x388   :  { %v1450_v34 = vrot.slane %v1434_v10, 7  ;;  %v1405_v48 = vadd.f32 %v3028_v50, %v1404_v43  ;;  %1630 = vrot.lane.b32.xlu0 %v1527_v8, %s2305_s17  ;;  %1568 = vrot.lane.b32.xlu1 %v1432_v23, %s2304_s3  ;;  %v1498_v40 = vrot.slane %v1434_v10, 1  ;;  %v1519_v16 = vsel %vm3489_vm6, %v1503_v60, %v1488_v45 }
 0x389   :  { %v1406_v2 = vpop.f32.mrf.mxu0 }
 0x38a   :  { %v1435_v62 = vmax.f32 %v1405_v48, 0.0  ;;  %v3159_v13 = vsel %vm3482_vm4, %v1449_v4, %v1450_v34  ;;  %v1509_v49 = vsel %vm3485_vm10, %v1497_v24, %v1498_v40  ;;  %vm3490_vm4 = vmmov %vm3478_vm1  ;;  %vm3495_vm1 = vcmask 785408  }
 0x38b   :  { %v1504_v58 = vsel %vm3490_vm4, %v1502_v37, %v1503_v60  ;;  %vm3501_vm6 = vmmov %vm3495_vm1 }
 0x38c   :  { %v1451_v57 = vrot.slane %v1435_v62, 7  ;;  %1642 = vrot.lane.b32.xlu0 %v1533_v3, %s2305_s17  ;;  %1580 = vrot.lane.b32.xlu1 %v3111_v5, %s2304_s3  ;;  %v1499_v9 = vrot.slane %v1435_v62, 1 }
 0x38e   :  { %v3168_v23 = vsel %vm3483_vm14, %v1451_v57, %v1452_v25  ;;  %v3172_v27 = vsel %vm3484_vm8, %v1450_v34, %v1451_v57  ;;  %v1529_v25 = vsel %vm3486_vm5, %v1509_v49, 0.0  ;;  %v1508_v50 = vsel %vm3487_vm7, %v1498_v40, %v1499_v9  ;;  %vm3498_vm5 = vmmov %vm3495_vm1 }
 0x38f   :  { %v1507_v29 = vsel %vm3488_vm2, %v1499_v9, %v1500_v41  ;;  %vm3493_vm14 = vcmask 523264   ;;  %v1474_v34 = vsel %vm2661_vm15, %v3057_v59, 0.0 }
 0x390   :  { %1632 = vrot.lane.b32.xlu0 %v1510_v30, %s2305_s17  ;;  %1570 = vrot.lane.b32.xlu1 %v1433_v6, %s2304_s3  ;;  %v1531_v39 = vsel %vm2543_vm9, %v1507_v29, 0.0  ;;  %v1535_v6 = vsel %vm2638_vm11, %v1519_v16, 0.0  ;;  %vm3491_vm9 = vmmov %vm3484_vm8  ;;  %vm3492_vm11 = vcmask 261120  }
 0x391   :  { %v1471_v45 = vsel %vm3491_vm9, %v1455_v55, %v1440_v26  ;;  %vm3494_vm8 = vmmov %vm3492_vm11 }
 0x392   :  { %v1472_v54 = vsel %vm2656_vm12, %v1471_v45, 0.0  ;;  %vm3496_vm12 = vmmov %vm3493_vm14 }
 0x393   :  { %vm3497_vm10 = vmmov %vm3494_vm8 }
 0x394   :  { %1634 = vrot.lane.b32.xlu0 %v1529_v25, %s2305_s17  ;;  %1572 = vrot.lane.b32.xlu1 %v1434_v10, %s2304_s3  ;;  %vm3499_vm7 = vmmov %vm3496_vm12 }
 0x395   :  { %vm3500_vm2 = vmmov %vm3494_vm8 }
 0x396   :  { %vm3502_vm4 = vmmov %vm3499_vm7 }
 0x397   :  { %vm3503_vm15 = vmmov %vm3500_vm2 }
 0x398   :  { %1636 = vrot.lane.b32.xlu0 %v1508_v50, %s2305_s17  ;;  %1574 = vrot.lane.b32.xlu1 %v1435_v62, %s2304_s3  ;;  %vm3504_vm9 = vmmov %vm3495_vm1 }
 0x39c   :  { %1638 = vrot.lane.b32.xlu0 %v1531_v39, %s2305_s17  ;;  %1582 = vrot.lane.b32.xlu1 %v3183_v36, %s2304_s3 }
 0x3a0   :  { %1644 = vrot.lane.b32.xlu0 %v1504_v58, %s2305_s17  ;;  %1646 = vrot.lane.b32.xlu1 %v1535_v6, %s2305_s17  ;;  %v1478_v6 = vsel %vm3509_vm13, %v3101_v12, 0.0  ;;  %s1973_s17 = sshll.u32 %s2307_s7, 4  ;;  %s1974_s17 = int_to_ptr.vmem [resolvable:$true] %s1973_s17 }
 0x3a1   :  { %s2282_s19 = scalar_lea.vmem %s1974_s17, 16  ;;  %s2286_s20 = scalar_lea.vmem %s1974_s17, 32 }
 0x3a2   :  { %p2283_p0 = scmp.ne.s32.totalorder %s1974_s17, %s2282_s19  ;;  %p2287_p1 = scmp.lt.s32.totalorder %s1974_s17, %s1974_s17 }
 0x3a3   :  { %p2288_p2 = scmp.lt.s32.totalorder %s2286_s20, %s2282_s19 }
 0x3a5   :  { %p2289_p3 = por %p2288_p2, %p2287_p1 }
 0x3a7   :  { %p2290_p4 = pnand %p2289_p3, %p2283_p0 }
 0x3d2   :  { %v1553_v41 = vpop.permute.xlu0 %1552 }
 0x3d3   :  { %v1664_v37 = vsel %vm3492_vm11, %v1472_v54, %v1553_v41  ;;  %vm3505_vm11 = vmmov %vm3502_vm4 }
 0x3d6   :  { %v1555_v46 = vpop.permute.xlu1 %1554 }
 0x3d7   :  { %v1665_v26 = vsel %vm3494_vm8, %v3048_v52, %v1555_v46  ;;  %vm3507_vm8 = vmmov %vm3495_vm1 }
 0x3da   :  { %v1557_v4 = vpop.permute.xlu0 %1556  ;;  %v1617_v44 = vpop.permute.xlu1 %1616 }
 0x3db   :  { %v1680_v0 = vsel %vm3493_vm14, %v1664_v37, %v1617_v44  ;;  %v1666_v48 = vsel %vm3497_vm10, %v1474_v34, %v1557_v4  ;;  %vm3506_vm14 = vmmov %vm3500_vm2  ;;  %v1484_v4 = vsel %vm2728_vm3, %v3168_v23, 0.0 }
 0x3dc   :  { %v1703_v11 = vmul.f32 %v3221_v17, %v1680_v0  ;;  %vm3511_vm10 = vmmov %vm3498_vm5 }
 0x3de   :  { %v1619_v28 = vpop.permute.xlu0 %1618  ;;  %v1559_v10 = vpop.permute.xlu1 %1558  ;;  %v1719_v31 = vsel %vm3495_vm1, %v1703_v11, 0.0  ;;  %vm3508_vm1 = vmmov %vm3502_vm4 }
 0x3df   :  { %v1681_v43 = vsel %vm3496_vm12, %v1665_v26, %v1619_v28  ;;  %1720 = vadd.xlane.f32.xlu0 %v1719_v31  ;;  %v1667_v3 = vsel %vm3500_vm2, %v3068_v32, %v1559_v10  ;;  %vm3510_vm12 = vmmov %vm3500_vm2 }
 0x3e0   :  { %v1704_v8 = vmul.f32 %v3221_v17, %v1681_v43 }
 0x3e2   :  { %v1621_v19 = vpop.permute.xlu0 %1620  ;;  %v1561_v2 = vpop.permute.xlu1 %1560  ;;  %v1722_v62 = vsel %vm3498_vm5, %v1704_v8, 0.0  ;;  %vm3512_vm5 = vmmov %vm3508_vm1 }
 0x3e3   :  { %v1682_v52 = vsel %vm3499_vm7, %v1666_v48, %v1621_v19  ;;  %1723 = vadd.xlane.f32.xlu1 %v1722_v62  ;;  %v1668_v49 = vsel %vm3503_vm15, %v1476_v38, %v1561_v2  ;;  %vm3513_vm7 = vmmov %vm3500_vm2 }
 0x3e4   :  { %v1705_v24 = vmul.f32 %v3221_v17, %v1682_v52  ;;  %vm3514_vm2 = vmmov %vm3501_vm6 }
 0x3e5   :  { %vm3517_vm15 = vmmov %vm3514_vm2 }
 0x3e6   :  { %v1623_v40 = vpop.permute.xlu0 %1622  ;;  %v1563_v57 = vpop.permute.xlu1 %1562  ;;  %v1725_v30 = vsel %vm3501_vm6, %v1705_v24, 0.0  ;;  %vm3515_vm6 = vmmov %vm3508_vm1 }
 0x3e7   :  { %v1683_v35 = vsel %vm3502_vm4, %v1667_v3, %v1623_v40  ;;  %1726 = vadd.xlane.f32.xlu0 %v1725_v30  ;;  %v1669_v29 = vsel %vm3506_vm14, %v3089_v56, %v1563_v57  ;;  %vm3516_vm4 = vmmov %vm3513_vm7 }
 0x3e8   :  { %v1706_v59 = vmul.f32 %v3221_v17, %v1683_v35  ;;  %vm3519_vm3 = vmmov %vm3516_vm4 }
 0x3e9   :  { %vm3521_vm14 = vmmov %vm3508_vm1 }
 0x3ea   :  { %v1625_v9 = vpop.permute.xlu0 %1624  ;;  %v1565_v25 = vpop.permute.xlu1 %1564  ;;  %v1728_v50 = vsel %vm3504_vm9, %v1706_v59, 0.0  ;;  %vm3518_vm9 = vmmov %vm3508_vm1 }
 0x3eb   :  { %v1684_v32 = vsel %vm3505_vm11, %v1668_v49, %v1625_v9  ;;  %1729 = vadd.xlane.f32.xlu0 %v1728_v50  ;;  %v1670_v41 = vsel %vm3510_vm12, %v1478_v6, %v1565_v25  ;;  %vm3520_vm11 = vmmov %vm3514_vm2 }
 0x3ec   :  { %v1707_v60 = vmul.f32 %v3221_v17, %v1684_v32  ;;  %vm3524_vm13 = vmmov %vm3514_vm2 }
 0x3ed   :  { %vm3525_vm12 = vmmov %vm3512_vm5 }
 0x3ee   :  { %v1627_v39 = vpop.permute.xlu0 %1626  ;;  %v1577_v16 = vpop.permute.xlu1 %1576  ;;  %v1731_v58 = vsel %vm3507_vm8, %v1707_v60, 0.0  ;;  %vm3522_vm8 = vnez %v3403_v47 }
 0x3ef   :  { %v1685_v63 = vsel %vm3508_vm1, %v1669_v29, %v1627_v39  ;;  %1732 = vadd.xlane.f32.xlu1 %v1731_v58  ;;  %v1676_v44 = vsel %vm3513_vm7, %v1484_v4, %v1577_v16  ;;  %v1480_v62 = vsel %vm3522_vm8, %v3136_v33, 0.0  ;;  %vm3523_vm1 = vmmov %vm3519_vm3  ;;  %v1486_v39 = vsel %vm3457_vm0, %v3132_v20, 0.0 }
 0x3f0   :  { %v1708_v22 = vmul.f32 %v3221_v17, %v1685_v63  ;;  %vm3528_vm7 = vmmov %vm3515_vm6 }
 0x3f1   :  { %vm3536_vm0 = vmmov %vm3514_vm2 }
 0x3f2   :  { %v1629_v45 = vpop.permute.xlu0 %1628  ;;  %v1567_v46 = vpop.permute.xlu1 %1566  ;;  %v1734_v54 = vsel %vm3511_vm10, %v1708_v22, 0.0  ;;  %vm3526_vm10 = vmmov %vm3523_vm1 }
 0x3f3   :  { %v1686_v56 = vsel %vm3512_vm5, %v1670_v41, %v1629_v45  ;;  %1735 = vadd.xlane.f32.xlu0 %v1734_v54  ;;  %v1671_v28 = vsel %vm3516_vm4, %v3121_v7, %v1567_v46  ;;  %vm3527_vm5 = vmmov %vm3514_vm2  ;;  %v2035_v54 = vld [vmem:[#allocation2] ss:$0 sm:$0xff] }
 0x3f4   :  { %v1709_v37 = vmul.f32 %v3221_v17, %v1686_v56  ;;  %vm3530_vm4 = vmmov %vm3528_vm7 }
 0x3f5   :  { %vm3537_vm8 = vmmov %vm3530_vm4 }
 0x3f6   :  { %v1641_v0 = vpop.permute.xlu0 %1640  ;;  %v1579_v1 = vpop.permute.xlu1 %1578  ;;  %v1737_v12 = vsel %vm3514_vm2, %v1709_v37, 0.0 }
 0x3f7   :  { %v1692_v11 = vsel %vm3515_vm6, %v1676_v44, %v1641_v0  ;;  %1738 = vadd.xlane.f32.xlu1 %v1737_v12  ;;  %v1677_v8 = vsel %vm3519_vm3, %v3115_v61, %v1579_v1  ;;  %vm3529_vm6 = vmmov %vm3523_vm1 }
 0x3f8   :  { %v1715_v26 = vmul.f32 %v3221_v17, %v1692_v11  ;;  %vm3533_vm3 = vmmov %vm3523_vm1 }
 0x3fa   :  { %v1631_v10 = vpop.permute.xlu0 %1630  ;;  %v1569_v31 = vpop.permute.xlu1 %1568  ;;  %v1755_v43 = vsel %vm3517_vm15, %v1715_v26, 0.0  ;;  %vm3531_vm15 = vnez %v3405_v51 }
 0x3fb   :  { %v1687_v21 = vsel %vm3518_vm9, %v1671_v28, %v1631_v10  ;;  %1756 = vadd.xlane.f32.xlu1 %v1755_v43  ;;  %v1672_v52 = vsel %vm3523_vm1, %v1480_v62, %v1569_v31  ;;  %v1482_v16 = vsel %vm3531_vm15, %v3159_v13, 0.0  ;;  %vm3532_vm9 = vcmp.lt.s32.totalorder %v2406_v15, 1 }
 0x3fc   :  { %v1710_v23 = vmul.f32 %v3221_v17, %v1687_v21  ;;  %vm1893_vm15 = vcmask 392512  }
 0x3fe   :  { %v1643_v34 = vpop.permute.xlu0 %1642  ;;  %v1581_v48 = vpop.permute.xlu1 %1580  ;;  %v1740_v19 = vsel %vm3520_vm11, %v1710_v23, 0.0  ;;  %vm3534_vm11 = vmmov %vm3523_vm1 }
 0x3ff   :  { %v1693_v2 = vsel %vm3521_vm14, %v1677_v8, %v1643_v34  ;;  %1741 = vadd.xlane.f32.xlu0 %v1740_v19  ;;  %v1678_v58 = vsel %vm3533_vm3, %v1486_v39, %v1581_v48  ;;  %vm3535_vm14 = vmmov %vm3523_vm1  ;;  %vm1907_vm3 = vcmask 523712  }
 0x400   :  { %v1716_v7 = vmul.f32 %v3221_v17, %v1693_v2  ;;  %vm3538_vm1 = vmmov %vm3530_vm4 }
 0x402   :  { %v1633_v24 = vpop.permute.xlu0 %1632  ;;  %v1571_v3 = vpop.permute.xlu1 %1570  ;;  %v1758_v40 = vsel %vm3524_vm13, %v1716_v7, 0.0  ;;  %vm3539_vm13 = vmmov %vm3538_vm1 }
 0x403   :  { %v1688_v61 = vsel %vm3525_vm12, %v1672_v52, %v1633_v24  ;;  %1759 = vadd.xlane.f32.xlu0 %v1758_v40  ;;  %v1673_v30 = vsel %vm3526_vm10, %v3150_v18, %v1571_v3  ;;  %vm3540_vm12 = vmmov %vm3536_vm0 }
 0x404   :  { %v1711_v57 = vmul.f32 %v3221_v17, %v1688_v61  ;;  %vm3541_vm10 = vmmov %vm3536_vm0 }
 0x406   :  { %v1635_v35 = vpop.permute.xlu0 %1634  ;;  %v1573_v59 = vpop.permute.xlu1 %1572  ;;  %v1743_v38 = vsel %vm3527_vm5, %v1711_v57, 0.0  ;;  %vm3542_vm5 = vmmov %vm3536_vm0 }
 0x407   :  { %v1689_v47 = vsel %vm3528_vm7, %v1673_v30, %v1635_v35  ;;  %1744 = vadd.xlane.f32.xlu1 %v1743_v38  ;;  %v1674_v63 = vsel %vm3534_vm11, %v1482_v16, %v1573_v59  ;;  %vm1865_vm7 = vcmask 130112   ;;  %vm1914_vm11 = vcmask 589312  }
 0x408   :  { %v1712_v33 = vmul.f32 %v3221_v17, %v1689_v47 }
 0x40a   :  { %v1637_v49 = vpop.permute.xlu0 %1636  ;;  %v1575_v9 = vpop.permute.xlu1 %1574  ;;  %v1746_v25 = vsel %vm3514_vm2, %v1712_v33, 0.0  ;;  %vm1872_vm2 = vcmask 195712  }
 0x40b   :  { %1747 = vadd.xlane.f32.xlu0 %v1746_v25  ;;  %v1675_v50 = vsel %vm3529_vm6, %v3172_v27, %v1575_v9  ;;  %v1456_v27 = vsel %vm3532_vm9, %v1454_v53, %v1455_v55  ;;  %v1690_v51 = vsel %vm3537_vm8, %v1674_v63, %v1637_v49  ;;  %vm1879_vm6 = vcmask 261312  }
 0x40c   :  { %v1713_v45 = vmul.f32 %v3221_v17, %v1690_v51  ;;  %vm1900_vm9 = vcmask 458112   ;;  %vm1935_vm8 = vcmask 786112  }
 0x40e   :  { %v1639_v32 = vpop.permute.xlu0 %1638  ;;  %v1583_v60 = vpop.permute.xlu1 %1582  ;;  %v1749_v46 = vsel %vm3542_vm5, %v1713_v45, 0.0 }
 0x40f   :  { %v1691_v18 = vsel %vm3530_vm4, %v1675_v50, %v1639_v32  ;;  %v1679_v22 = vsel %vm3535_vm14, %v1456_v27, %v1583_v60  ;;  %v1855_v32 = vand.u32 127, %v36_v14  ;;  %vm1886_vm4 = vcmask 326912  }
 0x410   :  { %v1714_v29 = vmul.f32 %v3221_v17, %v1691_v18  ;;  %vm1921_vm14 = vcmask 654912  }
 0x411   :  { %v1860_v18 = vadd.s32 4294967288, %v1855_v32  ;;  %v1874_v39 = vadd.s32 4294967272, %v1855_v32  ;;  %v1881_v16 = vadd.s32 4294967264, %v1855_v32 }
 0x412   :  { %v1645_v6 = vpop.permute.xlu0 %1644  ;;  %v1647_v42 = vpop.permute.xlu1 %1646  ;;  %v1752_v20 = vsel %vm3536_vm0, %v1714_v29, 0.0  ;;  %v1867_v29 = vadd.s32 4294967280, %v1855_v32  ;;  %vm1928_vm0 = vcmask 720512  }
 0x413   :  { %v1694_v13 = vsel %vm3538_vm1, %v1678_v58, %v1645_v6  ;;  %v1695_v36 = vsel %vm3539_vm13, %v1679_v22, %v1647_v42  ;;  %1753 = vadd.xlane.f32.xlu0 %v1752_v20  ;;  %v1863_v27 = vsub.s32 %v1860_v18, %v2406_v15  ;;  %v1888_v58 = vadd.s32 4294967256, %v1855_v32 }
 0x414   :  { %v1718_v5 = vmul.f32 %v3221_v17, %v1695_v36  ;;  %v1717_v53 = vmul.f32 %v3221_v17, %v1694_v13  ;;  %v1870_v22 = vsub.s32 %v1867_v29, %v2406_v15  ;;  %v1895_v6 = vadd.s32 4294967248, %v1855_v32 }
 0x415   :  { %v1858_v20 = vsub.s32 %v1855_v32, %v2406_v15  ;;  %v1877_v51 = vsub.s32 %v1874_v39, %v2406_v15  ;;  %v1902_v13 = vadd.s32 4294967240, %v1855_v32  ;;  %v1884_v14 = vsub.s32 %v1881_v16, %v2406_v15 }
 0x416   :  { %v1764_v55 = vsel %vm3540_vm12, %v1718_v5, 0.0  ;;  %v1761_v41 = vsel %vm3541_vm10, %v1717_v53, 0.0  ;;  %v1909_v36 = vadd.s32 4294967232, %v1855_v32  ;;  %v1891_v53 = vsub.s32 %v1888_v58, %v2406_v15 }
 0x417   :  { %1765 = vadd.xlane.f32.xlu0 %v1764_v55  ;;  %1762 = vadd.xlane.f32.xlu1 %v1761_v41  ;;  %v1916_v55 = vadd.s32 4294967224, %v1855_v32  ;;  %v1898_v45 = vsub.s32 %v1895_v6, %v2406_v15  ;;  %vm1942_vm1 = vcmask 851712   ;;  %vm1949_vm13 = vcmask 917312  }
 0x418   :  { %vm1956_vm12 = vcmask 982912   ;;  %vm1963_vm10 = vcmask 1048512  }
 0x41b   :  { %1750 = vadd.xlane.f32.xlu1 %v1749_v46 }
 0x468   :  { %v1721_v56 = vpop.xlane.xlu0 %1720 }
 0x469   :  { %v1774_v37 = vadd.f32 %v2035_v54, %v1721_v56  ;;  %v1905_v56 = vsub.s32 %v1902_v13, %v2406_v15 }
 0x46b   :  { %1807 = vperm.xlu1 %2254, %v1774_v37  }
 0x46c   :  { %v1724_v4 = vpop.xlane.xlu1 %1723 }
 0x46d   :  { %v1775_v44 = vadd.f32 %v2035_v54, %v1724_v4  ;;  %v1912_v4 = vsub.s32 %v1909_v36, %v2406_v15 }
 0x46f   :  { %1810 = vperm.xlu0 %2255, %v1775_v44  }
 0x470   :  { %v1727_v0 = vpop.xlane.xlu0 %1726 }
 0x471   :  { %v1776_v1 = vadd.f32 %v2035_v54, %v1727_v0  ;;  %v1923_v0 = vadd.s32 4294967216, %v1855_v32 }
 0x473   :  { %1813 = vperm.xlu1 %2254, %v1776_v1  }
 0x474   :  { %v1730_v12 = vpop.xlane.xlu0 %1729 }
 0x475   :  { %v1777_v11 = vadd.f32 %v2035_v54, %v1730_v12 }
 0x477   :  { %1816 = vperm.xlu1 %2254, %v1777_v11   ;;  %v1919_v11 = vsub.s32 %v1916_v55, %v2406_v15 }
 0x478   :  { %v1733_v26 = vpop.xlane.xlu1 %1732 }
 0x479   :  { %v1778_v17 = vadd.f32 %v2035_v54, %v1733_v26  ;;  %v1930_v26 = vadd.s32 4294967208, %v1855_v32 }
 0x47b   :  { %1819 = vperm.xlu1 %2254, %v1778_v17  }
 0x47c   :  { %v1736_v28 = vpop.xlane.xlu0 %1735 }
 0x47d   :  { %v1779_v10 = vadd.f32 %v2035_v54, %v1736_v28 }
 0x47f   :  { %1822 = vperm.xlu1 %2254, %v1779_v10   ;;  %v1937_v10 = vadd.s32 4294967200, %v1855_v32 }
 0x480   :  { %v1739_v31 = vpop.xlane.xlu1 %1738 }
 0x481   :  { %v1780_v43 = vadd.f32 %v2035_v54, %v1739_v31 }
 0x483   :  { %1825 = vperm.xlu1 %2254, %v1780_v43  }
 0x484   :  { %v1757_v21 = vpop.xlane.xlu1 %1756 }
 0x485   :  { %v1786_v23 = vadd.f32 %v2035_v54, %v1757_v21 }
 0x487   :  { %1843 = vperm.xlu0 %2255, %v1786_v23   ;;  %v1944_v23 = vadd.s32 4294967192, %v1855_v32 }
 0x488   :  { %v1742_v8 = vpop.xlane.xlu0 %1741 }
 0x489   :  { %v1781_v34 = vadd.f32 %v2035_v54, %v1742_v8 }
 0x48b   :  { %1828 = vperm.xlu1 %2254, %v1781_v34  }
 0x48c   :  { %v1760_v48 = vpop.xlane.xlu0 %1759 }
 0x48d   :  { %v1787_v19 = vadd.f32 %v2035_v54, %v1760_v48 }
 0x48f   :  { %1846 = vperm.xlu1 %2254, %v1787_v19   ;;  %v1926_v19 = vsub.s32 %v1923_v0, %v2406_v15 }
 0x490   :  { %v1745_v2 = vpop.xlane.xlu1 %1744 }
 0x491   :  { %v1782_v7 = vadd.f32 %v2035_v54, %v1745_v2  ;;  %v1951_v2 = vadd.s32 4294967184, %v1855_v32 }
 0x493   :  { %1831 = vperm.xlu1 %2254, %v1782_v7  }
 0x494   :  { %v1748_v62 = vpop.xlane.xlu0 %1747 }
 0x495   :  { %v1783_v52 = vadd.f32 %v2035_v54, %v1748_v62 }
 0x497   :  { %1834 = vperm.xlu1 %2254, %v1783_v52   ;;  %v1933_v52 = vsub.s32 %v1930_v26, %v2406_v15 }
 0x49c   :  { %v1754_v24 = vpop.xlane.xlu0 %1753 }
 0x49d   :  { %v1785_v3 = vadd.f32 %v2035_v54, %v1754_v24  ;;  %v1958_v24 = vadd.s32 4294967176, %v1855_v32 }
 0x49f   :  { %1840 = vperm.xlu1 %2254, %v1785_v3  }
 0x4a0   :  { %v1766_v40 = vpop.xlane.xlu0 %1765  ;;  %v1763_v61 = vpop.xlane.xlu1 %1762 }
 0x4a1   :  { %v1789_v57 = vadd.f32 %v2035_v54, %v1766_v40  ;;  %v1788_v59 = vadd.f32 %v2035_v54, %v1763_v61  ;;  %v1940_v40 = vsub.s32 %v1937_v10, %v2406_v15 }
 0x4a3   :  { %1852 = vperm.xlu1 %2254, %v1789_v57   ;;  %v1947_v57 = vsub.s32 %v1944_v23, %v2406_v15 }
 0x4a4   :  { %v1751_v30 = vpop.xlane.xlu1 %1750 }
 0x4a5   :  { %v1784_v35 = vadd.f32 %v2035_v54, %v1751_v30 }
 0x4a7   :  { %1837 = vperm.xlu0 %2255, %v1784_v35  }
 0x4ab   :  { %1849 = vperm.xlu0 %2255, %v1788_v59  }
 0x4e6   :  { %v1808_v38 = vpop.permute.xlu1 %1807 }
 0x4e7   :  { %v1859_v46 = vrot.slane %v1808_v38, %v1858_v20  ;;  %v1954_v38 = vsub.s32 %v1951_v2, %v2406_v15 }
 0x4ea   :  { %v1811_v63 = vpop.permute.xlu0 %1810 }
 0x4eb   :  { %v1864_v5 = vrot.slane %v1811_v63, %v1863_v27 }
 0x4ed   :  { %v1866_v1 = vsel %vm1865_vm7, %v1864_v5, %v1859_v46 }
 0x4ee   :  { %v1814_v47 = vpop.permute.xlu1 %1813 }
 0x4ef   :  { %v1871_v41 = vrot.slane %v1814_v47, %v1870_v22 }
 0x4f1   :  { %v1873_v17 = vsel %vm1872_vm2, %v1871_v41, %v1866_v1 }
 0x4f2   :  { %v1817_v33 = vpop.permute.xlu1 %1816 }
 0x4f3   :  { %v1878_v54 = vrot.slane %v1817_v33, %v1877_v51 }
 0x4f5   :  { %v1880_v31 = vsel %vm1879_vm6, %v1878_v54, %v1873_v17 }
 0x4f6   :  { %v1820_v49 = vpop.permute.xlu1 %1819 }
 0x4f7   :  { %v1885_v37 = vrot.slane %v1820_v49, %v1884_v14  ;;  %v1961_v49 = vsub.s32 %v1958_v24, %v2406_v15 }
 0x4f9   :  { %v1887_v8 = vsel %vm1886_vm4, %v1885_v37, %v1880_v31 }
 0x4fa   :  { %v1823_v9 = vpop.permute.xlu1 %1822 }
 0x4fb   :  { %v1892_v12 = vrot.slane %v1823_v9, %v1891_v53 }
 0x4fd   :  { %v1894_v7 = vsel %vm1893_vm15, %v1892_v12, %v1887_v8 }
 0x4fe   :  { %v1826_v25 = vpop.permute.xlu1 %1825 }
 0x4ff   :  { %v1899_v28 = vrot.slane %v1826_v25, %v1898_v45 }
 0x501   :  { %v1901_v3 = vsel %vm1900_vm9, %v1899_v28, %v1894_v7 }
 0x502   :  { %v1844_v43 = vpop.permute.xlu0 %1843 }
 0x503   :  { %v1941_v9 = vrot.slane %v1844_v43, %v1940_v40 }
 0x506   :  { %v1829_v50 = vpop.permute.xlu1 %1828 }
 0x507   :  { %v1906_v21 = vrot.slane %v1829_v50, %v1905_v56 }
 0x509   :  { %v1908_v61 = vsel %vm1907_vm3, %v1906_v21, %v1901_v3 }
 0x50a   :  { %v3322_v60 = vpop.permute.xlu1 %1846 }
 0x50b   :  { %v1948_v32 = vrot.slane %v3322_v60, %v1947_v57 }
 0x50e   :  { %v1832_v42 = vpop.permute.xlu1 %1831 }
 0x50f   :  { %v1913_v34 = vrot.slane %v1832_v42, %v1912_v4 }
 0x511   :  { %v1915_v35 = vsel %vm1914_vm11, %v1913_v34, %v1908_v61 }
 0x512   :  { %v1835_v44 = vpop.permute.xlu1 %1834 }
 0x513   :  { %v1920_v62 = vrot.slane %v1835_v44, %v1919_v11 }
 0x515   :  { %v1922_v47 = vsel %vm1921_vm14, %v1920_v62, %v1915_v35 }
 0x51a   :  { %v1841_v48 = vpop.permute.xlu1 %1840 }
 0x51b   :  { %v1934_v33 = vrot.slane %v1841_v48, %v1933_v52 }
 0x51e   :  { %v1853_v25 = vpop.permute.xlu1 %1852 }
 0x51f   :  { %v1962_v27 = vrot.slane %v1853_v25, %v1961_v49 }
 0x522   :  { %v1838_v30 = vpop.permute.xlu0 %1837 }
 0x523   :  { %v1927_v59 = vrot.slane %v1838_v30, %v1926_v19 }
 0x525   :  { %v1929_v50 = vsel %vm1928_vm0, %v1927_v59, %v1922_v47 }
 0x526   :  { %v1936_v18 = vsel %vm1935_vm8, %v1934_v33, %v1929_v50  ;;  %v1850_v29 = vpop.permute.xlu0 %1849 }
 0x527   :  { %v1955_v39 = vrot.slane %v1850_v29, %v1954_v38  ;;  %v1943_v16 = vsel %vm1942_vm1, %v1941_v9, %v1936_v18 }
 0x528   :  { %v1950_v58 = vsel %vm1949_vm13, %v1948_v32, %v1943_v16 }
 0x529   :  { %v1957_v63 = vsel %vm1956_vm12, %v1955_v39, %v1950_v58 }
 0x52a   :  { %v1964_v15 = vsel %vm1963_vm10, %v1962_v27, %v1957_v63 }
 0x52b   :  { %1966 = vst [vmem:[#allocation3] sm:$0x1] %v1964_v15 }
 0x52c   :  { %2293 = shalt.err (!%p2290_p4)
}
 0x52d   :  { %1976 = dma.vmem_to_hbm [thread:$0]  %s1974_s17, 16, %s3361_s9, [#allocation4]  }
 0x52e   :  { %2302 = dma.done.wait [#allocation4], 16  }
 0x52f   :  { %2303 = vsyncadd [#allocation4], 4294967280 }
 0x530   :  { %1980 = vsyncpa [#allocation4], 1 }

</bundles_post_ra>
